<compile_context>
chip_gen: v7x
topology: tpu7x:2x2x1
jax: 0.10.0
libtpu: 0.0.40
codegen_flags: <defaults>
</compile_context>

<pallas_src>
import jax
import jax.numpy as jnp
import numpy as np
from jax.experimental import pallas as pl
from jax.experimental.pallas import tpu as pltpu


def rnn_fused_kernel(tok_ref, emb_ref, wih_t_ref, whh_t_ref, bias_ref,
                     wfc_t_ref, bfc_ref, logits_ref, hid_ref, h_all_ref):
    """Fused embedding lookup -> input projection -> tanh recurrence -> fc.

    tok_ref    : (B*T, 1) int32  token ids, batch-major rows (row = b*T + t)
    emb_ref    : (V, E)   f32    embedding table
    wih_t_ref  : (E, H)   f32    W_ih^T   (pre-transposed outside jit)
    whh_t_ref  : (H, H)   f32    W_hh^T   (pre-transposed outside jit)
    bias_ref   : (1, H)   f32    b_ih + b_hh (pre-summed outside jit)
    wfc_t_ref  : (H, V)   f32    W_fc^T   (pre-transposed outside jit)
    bfc_ref    : (1, V)   f32    b_fc
    logits_ref : (B, T, V) f32   output logits (batch-major, lane-dense)
    hid_ref    : (B, H)   f32    final hidden state
    h_all_ref  : (B, T, H) f32   VMEM scratch: per-step hidden states (writes are
                                 off the recurrence critical path)
    """
    B, T, V = logits_ref.shape
    BT = B * T
    H = hid_ref.shape[-1]

    # --- Phase 0+1: embedding lookup fused as a one-hot matmul, then the hoisted
    # input projection (one MXU pass for all B*T rows). The one-hot selection is
    # exact (1.0/0.0 weights), so numerics match a gather bit-for-bit.
    tok = tok_ref[...]                                          # (BT, 1) int32
    col = jax.lax.broadcasted_iota(jnp.int32, (BT, V), 1)       # (BT, V)
    onehot = (col == tok).astype(jnp.float32)                   # (BT, V)
    x = jnp.dot(onehot, emb_ref[...],
                preferred_element_type=jnp.float32)             # (BT, E)
    xw = jnp.dot(x, wih_t_ref[...],
                 preferred_element_type=jnp.float32) + bias_ref[...]   # (BT, H)
    # Free relayout: 16 batch-major sublanes -> (B, T, H); stays in vregs.
    xw_bth = xw.reshape(B, T, H)

    # --- Phase 2: tanh recurrence. Only the (B,H)@(H,H) matmul + tanh is serial.
    # W_hh^T is read from VMEM once and reused across the unrolled T-step loop;
    # the per-step input projection is a register slice, not a VMEM load.
    whh = whh_t_ref[...]                                        # (H, H), read once
    h = jnp.zeros((B, H), dtype=jnp.float32)
    for t in range(T):
        h = jnp.tanh(xw_bth[:, t, :]
                     + jnp.dot(h, whh, preferred_element_type=jnp.float32))
        h_all_ref[:, t, :] = h          # off-chain store, consumed once in Phase 3
    hid_ref[...] = h

    # --- Phase 3: hoisted fc projection over all B*T hidden states at once,
    # emitted directly in batch-major (B, T, V) layout (no transpose).
    h_flat = h_all_ref[...].reshape(BT, H)
    logits = jnp.dot(h_flat, wfc_t_ref[...],
                     preferred_element_type=jnp.float32) + bfc_ref[...]
    logits_ref[...] = logits.reshape(B, T, V)


def prepare_kernel_params(params):
    """One-time layout prep (call OUTSIDE jit): pre-transpose weights, pre-sum biases."""
    H = params["w_hh"].shape[0]
    V = params["w_fc"].shape[0]
    return {
        "embedding": jnp.asarray(params["embedding"]),          # (V, E)
        "w_ih_t": jnp.asarray(params["w_ih"]).T,                # (E, H)
        "w_hh_t": jnp.asarray(params["w_hh"]).T,                # (H, H)
        "bias": (params["b_ih"] + params["b_hh"]).reshape(1, H),
        "w_fc_t": jnp.asarray(params["w_fc"]).T,                # (H, V)
        "b_fc": jnp.asarray(params["b_fc"]).reshape(1, V),
    }


def simple_rnn_forward(tokens, kparams):
    """tokens: (B, T) int32. Returns (logits (B, T, V), hidden (1, B, H))."""
    emb = kparams["embedding"]
    V, E = emb.shape
    H = kparams["w_hh_t"].shape[0]
    B, T = tokens.shape

    # Batch-major token column (row = b*T + t); contiguous reshape, essentially free.
    tok_col = tokens.reshape(B * T, 1).astype(jnp.int32)

    vmem = pl.BlockSpec(memory_space=pltpu.MemorySpace.VMEM)
    logits, hid = pl.pallas_call(
        rnn_fused_kernel,
        out_shape=(
            jax.ShapeDtypeStruct((B, T, V), jnp.float32),
            jax.ShapeDtypeStruct((B, H), jnp.float32),
        ),
        # Single grid point: all operands (<1 MiB total) resident in VMEM; no
        # per-step pipeline overhead, no double-buffering of constant weights.
        in_specs=[vmem] * 7,
        out_specs=(vmem, vmem),
        scratch_shapes=[
            pltpu.VMEM((B, T, H), jnp.float32),   # h_all: per-step hidden states
        ],
    )(tok_col, emb, kparams["w_ih_t"], kparams["w_hh_t"], kparams["bias"],
      kparams["w_fc_t"], kparams["b_fc"])

    hidden = hid.reshape(1, B, H)      # PyTorch nn.RNN returns (num_layers, B, H)
    return logits, hidden


def reference_forward(tokens, params):
    """Pure-JAX reference (lax.scan) for correctness check."""
    emb = params["embedding"]
    w_ih, w_hh = params["w_ih"], params["w_hh"]
    b_ih, b_hh = params["b_ih"], params["b_hh"]
    w_fc, b_fc = params["w_fc"], params["b_fc"]
    B, T = tokens.shape
    H = w_hh.shape[0]

    x = jnp.take(emb, tokens, axis=0)              # (B, T, E)
    x_tm = jnp.transpose(x, (1, 0, 2))             # (T, B, E)

    def step(h, x_t):
        h_new = jnp.tanh(x_t @ w_ih.T + b_ih + h @ w_hh.T + b_hh)
        return h_new, h_new

    h0 = jnp.zeros((B, H), jnp.float32)
    h_last, outs = jax.lax.scan(step, h0, x_tm)    # outs: (T, B, H)
    logits = jnp.einsum("tbh,vh->tbv", outs, w_fc) + b_fc
    return jnp.transpose(logits, (1, 0, 2)), h_last.reshape(1, B, H)


def init_params(key, vocab_size, embed_size, hidden_size):
    k = jax.random.split(key, 7)
    s_rnn = 1.0 / np.sqrt(hidden_size)
    s_fc = 1.0 / np.sqrt(hidden_size)
    return {
        "embedding": jax.random.normal(k[0], (vocab_size, embed_size), jnp.float32),
        "w_ih": jax.random.uniform(k[1], (hidden_size, embed_size), jnp.float32, -s_rnn, s_rnn),
        "w_hh": jax.random.uniform(k[2], (hidden_size, hidden_size), jnp.float32, -s_rnn, s_rnn),
        "b_ih": jax.random.uniform(k[3], (hidden_size,), jnp.float32, -s_rnn, s_rnn),
        "b_hh": jax.random.uniform(k[4], (hidden_size,), jnp.float32, -s_rnn, s_rnn),
        "w_fc": jax.random.uniform(k[5], (vocab_size, hidden_size), jnp.float32, -s_fc, s_fc),
        "b_fc": jax.random.uniform(k[6], (vocab_size,), jnp.float32, -s_fc, s_fc),
    }


if __name__ == "__main__":
    VOCAB, EMBED, HIDDEN = 128, 128, 256
    B, T = 2, 8

    key = jax.random.PRNGKey(0)
    pkey, tkey = jax.random.split(key)
    params = init_params(pkey, VOCAB, EMBED, HIDDEN)
    tokens = jax.random.randint(tkey, (B, T), 0, VOCAB, dtype=jnp.int32)

    # One-time layout prep (outside jit): pre-transposed weights, pre-summed bias.
    kparams = prepare_kernel_params(params)

    logits, hidden = jax.jit(simple_rnn_forward)(tokens, kparams)
    logits = jax.block_until_ready(logits)
    hidden = jax.block_until_ready(hidden)

    ref_logits, ref_hidden = reference_forward(tokens, params)
    assert logits.shape == (B, T, VOCAB)
    assert hidden.shape == (1, B, HIDDEN)
    np.testing.assert_allclose(np.asarray(logits), np.asarray(ref_logits), rtol=1e-4, atol=1e-4)
    np.testing.assert_allclose(np.asarray(hidden), np.asarray(ref_hidden), rtol=1e-4, atol=1e-4)

    print("KERNEL_OK")
</pallas_src>

<mosaic_0001>
module attributes {stable_mosaic.version = 11 : i64} {
  func.func @rnn_fused_kernel(%arg0: memref<16x1xi32, #tpu.memory_space<vmem>>, %arg1: memref<128x128xf32, #tpu.memory_space<vmem>>, %arg2: memref<128x256xf32, #tpu.memory_space<vmem>>, %arg3: memref<256x256xf32, #tpu.memory_space<vmem>>, %arg4: memref<1x256xf32, #tpu.memory_space<vmem>>, %arg5: memref<256x128xf32, #tpu.memory_space<vmem>>, %arg6: memref<1x128xf32, #tpu.memory_space<vmem>>, %arg7: memref<2x8x128xf32, #tpu.memory_space<vmem>>, %arg8: memref<2x256xf32, #tpu.memory_space<vmem>>, %arg9: memref<2x8x256xf32, #tpu.memory_space<vmem>>) attributes {dimension_semantics = [], scalar_prefetch = 0 : i64, scratch_operands = 1 : i64, tpu.core_type = #tpu.core_type<tc>} {
    %c0 = arith.constant 0 : index
    %c0_0 = arith.constant 0 : index
    %0 = vector.load %arg0[%c0, %c0_0] : memref<16x1xi32, #tpu.memory_space<vmem>>, vector<16x1xi32>
    %1 = tpu.iota {dimensions = array<i32: 1>} : vector<16x128xi32>
    %2 = vector.broadcast %0 : vector<16x1xi32> to vector<16x128xi32>
    %3 = arith.cmpi eq, %1, %2 : vector<16x128xi32>
    %4 = arith.extui %3 : vector<16x128xi1> to vector<16x128xi32>
    %5 = arith.sitofp %4 : vector<16x128xi32> to vector<16x128xf32>
    %c0_1 = arith.constant 0 : index
    %c0_2 = arith.constant 0 : index
    %6 = vector.load %arg1[%c0_1, %c0_2] : memref<128x128xf32, #tpu.memory_space<vmem>>, vector<128x128xf32>
    %cst = arith.constant dense<0.000000e+00> : vector<16x128xf32>
    %7 = tpu.matmul %5, %6, %cst {dimension_numbers = #tpu.dot_dimension_numbers<[1], [0], [0], [1], [0, 0, 1, 1], [], []>} : vector<16x128xf32>, vector<128x128xf32>, vector<16x128xf32> -> vector<16x128xf32>
    %c0_3 = arith.constant 0 : index
    %c0_4 = arith.constant 0 : index
    %8 = vector.load %arg2[%c0_3, %c0_4] : memref<128x256xf32, #tpu.memory_space<vmem>>, vector<128x256xf32>
    %cst_5 = arith.constant dense<0.000000e+00> : vector<16x256xf32>
    %9 = tpu.matmul %7, %8, %cst_5 {dimension_numbers = #tpu.dot_dimension_numbers<[1], [0], [0], [1], [0, 0, 1, 1], [], []>} : vector<16x128xf32>, vector<128x256xf32>, vector<16x256xf32> -> vector<16x256xf32>
    %c0_6 = arith.constant 0 : index
    %c0_7 = arith.constant 0 : index
    %10 = vector.load %arg4[%c0_6, %c0_7] : memref<1x256xf32, #tpu.memory_space<vmem>>, vector<1x256xf32>
    %11 = vector.broadcast %10 : vector<1x256xf32> to vector<16x256xf32>
    %12 = arith.addf %9, %11 : vector<16x256xf32>
    %13 = vector.shape_cast %12 : vector<16x256xf32> to vector<2x8x256xf32>
    %c0_8 = arith.constant 0 : index
    %c0_9 = arith.constant 0 : index
    %14 = vector.load %arg3[%c0_8, %c0_9] : memref<256x256xf32, #tpu.memory_space<vmem>>, vector<256x256xf32>
    %cst_10 = arith.constant 0.000000e+00 : f32
    %15 = vector.broadcast %cst_10 : f32 to vector<2x256xf32>
    %16 = vector.extract_strided_slice %13 {offsets = [0, 0, 0], sizes = [2, 1, 256], strides = [1, 1, 1]} : vector<2x8x256xf32> to vector<2x1x256xf32>
    %17 = vector.shape_cast %16 : vector<2x1x256xf32> to vector<2x256xf32>
    %cst_11 = arith.constant dense<0.000000e+00> : vector<2x256xf32>
    %18 = tpu.matmul %15, %14, %cst_11 {dimension_numbers = #tpu.dot_dimension_numbers<[1], [0], [0], [1], [0, 0, 1, 1], [], []>} : vector<2x256xf32>, vector<256x256xf32>, vector<2x256xf32> -> vector<2x256xf32>
    %19 = arith.addf %17, %18 : vector<2x256xf32>
    %20 = math.tanh %19 : vector<2x256xf32>
    %c0_12 = arith.constant 0 : index
    %c0_13 = arith.constant 0 : index
    %c0_14 = arith.constant 0 : index
    %21 = vector.load %arg9[%c0_12, %c0_13, %c0_14] : memref<2x8x256xf32, #tpu.memory_space<vmem>>, vector<2x1x256xf32>
    %22 = vector.shape_cast %21 : vector<2x1x256xf32> to vector<2x256xf32>
    %23 = vector.shape_cast %20 : vector<2x256xf32> to vector<2x1x256xf32>
    tpu.vector_store %arg9[%c0_12, %c0_13, %c0_14], %23 {strides = array<i32>} : memref<2x8x256xf32, #tpu.memory_space<vmem>>, vector<2x1x256xf32>,
    %24 = vector.extract_strided_slice %13 {offsets = [0, 1, 0], sizes = [2, 1, 256], strides = [1, 1, 1]} : vector<2x8x256xf32> to vector<2x1x256xf32>
    %25 = vector.shape_cast %24 : vector<2x1x256xf32> to vector<2x256xf32>
    %cst_15 = arith.constant dense<0.000000e+00> : vector<2x256xf32>
    %26 = tpu.matmul %20, %14, %cst_15 {dimension_numbers = #tpu.dot_dimension_numbers<[1], [0], [0], [1], [0, 0, 1, 1], [], []>} : vector<2x256xf32>, vector<256x256xf32>, vector<2x256xf32> -> vector<2x256xf32>
    %27 = arith.addf %25, %26 : vector<2x256xf32>
    %28 = math.tanh %27 : vector<2x256xf32>
    %c0_16 = arith.constant 0 : index
    %c1 = arith.constant 1 : index
    %c0_17 = arith.constant 0 : index
    %29 = vector.load %arg9[%c0_16, %c1, %c0_17] : memref<2x8x256xf32, #tpu.memory_space<vmem>>, vector<2x1x256xf32>
    %30 = vector.shape_cast %29 : vector<2x1x256xf32> to vector<2x256xf32>
    %31 = vector.shape_cast %28 : vector<2x256xf32> to vector<2x1x256xf32>
    tpu.vector_store %arg9[%c0_16, %c1, %c0_17], %31 {strides = array<i32>} : memref<2x8x256xf32, #tpu.memory_space<vmem>>, vector<2x1x256xf32>,
    %32 = vector.extract_strided_slice %13 {offsets = [0, 2, 0], sizes = [2, 1, 256], strides = [1, 1, 1]} : vector<2x8x256xf32> to vector<2x1x256xf32>
    %33 = vector.shape_cast %32 : vector<2x1x256xf32> to vector<2x256xf32>
    %cst_18 = arith.constant dense<0.000000e+00> : vector<2x256xf32>
    %34 = tpu.matmul %28, %14, %cst_18 {dimension_numbers = #tpu.dot_dimension_numbers<[1], [0], [0], [1], [0, 0, 1, 1], [], []>} : vector<2x256xf32>, vector<256x256xf32>, vector<2x256xf32> -> vector<2x256xf32>
    %35 = arith.addf %33, %34 : vector<2x256xf32>
    %36 = math.tanh %35 : vector<2x256xf32>
    %c0_19 = arith.constant 0 : index
    %c2 = arith.constant 2 : index
    %c0_20 = arith.constant 0 : index
    %37 = vector.load %arg9[%c0_19, %c2, %c0_20] : memref<2x8x256xf32, #tpu.memory_space<vmem>>, vector<2x1x256xf32>
    %38 = vector.shape_cast %37 : vector<2x1x256xf32> to vector<2x256xf32>
    %39 = vector.shape_cast %36 : vector<2x256xf32> to vector<2x1x256xf32>
    tpu.vector_store %arg9[%c0_19, %c2, %c0_20], %39 {strides = array<i32>} : memref<2x8x256xf32, #tpu.memory_space<vmem>>, vector<2x1x256xf32>,
    %40 = vector.extract_strided_slice %13 {offsets = [0, 3, 0], sizes = [2, 1, 256], strides = [1, 1, 1]} : vector<2x8x256xf32> to vector<2x1x256xf32>
    %41 = vector.shape_cast %40 : vector<2x1x256xf32> to vector<2x256xf32>
    %cst_21 = arith.constant dense<0.000000e+00> : vector<2x256xf32>
    %42 = tpu.matmul %36, %14, %cst_21 {dimension_numbers = #tpu.dot_dimension_numbers<[1], [0], [0], [1], [0, 0, 1, 1], [], []>} : vector<2x256xf32>, vector<256x256xf32>, vector<2x256xf32> -> vector<2x256xf32>
    %43 = arith.addf %41, %42 : vector<2x256xf32>
    %44 = math.tanh %43 : vector<2x256xf32>
    %c0_22 = arith.constant 0 : index
    %c3 = arith.constant 3 : index
    %c0_23 = arith.constant 0 : index
    %45 = vector.load %arg9[%c0_22, %c3, %c0_23] : memref<2x8x256xf32, #tpu.memory_space<vmem>>, vector<2x1x256xf32>
    %46 = vector.shape_cast %45 : vector<2x1x256xf32> to vector<2x256xf32>
    %47 = vector.shape_cast %44 : vector<2x256xf32> to vector<2x1x256xf32>
    tpu.vector_store %arg9[%c0_22, %c3, %c0_23], %47 {strides = array<i32>} : memref<2x8x256xf32, #tpu.memory_space<vmem>>, vector<2x1x256xf32>,
    %48 = vector.extract_strided_slice %13 {offsets = [0, 4, 0], sizes = [2, 1, 256], strides = [1, 1, 1]} : vector<2x8x256xf32> to vector<2x1x256xf32>
    %49 = vector.shape_cast %48 : vector<2x1x256xf32> to vector<2x256xf32>
    %cst_24 = arith.constant dense<0.000000e+00> : vector<2x256xf32>
    %50 = tpu.matmul %44, %14, %cst_24 {dimension_numbers = #tpu.dot_dimension_numbers<[1], [0], [0], [1], [0, 0, 1, 1], [], []>} : vector<2x256xf32>, vector<256x256xf32>, vector<2x256xf32> -> vector<2x256xf32>
    %51 = arith.addf %49, %50 : vector<2x256xf32>
    %52 = math.tanh %51 : vector<2x256xf32>
    %c0_25 = arith.constant 0 : index
    %c4 = arith.constant 4 : index
    %c0_26 = arith.constant 0 : index
    %53 = vector.load %arg9[%c0_25, %c4, %c0_26] : memref<2x8x256xf32, #tpu.memory_space<vmem>>, vector<2x1x256xf32>
    %54 = vector.shape_cast %53 : vector<2x1x256xf32> to vector<2x256xf32>
    %55 = vector.shape_cast %52 : vector<2x256xf32> to vector<2x1x256xf32>
    tpu.vector_store %arg9[%c0_25, %c4, %c0_26], %55 {strides = array<i32>} : memref<2x8x256xf32, #tpu.memory_space<vmem>>, vector<2x1x256xf32>,
    %56 = vector.extract_strided_slice %13 {offsets = [0, 5, 0], sizes = [2, 1, 256], strides = [1, 1, 1]} : vector<2x8x256xf32> to vector<2x1x256xf32>
    %57 = vector.shape_cast %56 : vector<2x1x256xf32> to vector<2x256xf32>
    %cst_27 = arith.constant dense<0.000000e+00> : vector<2x256xf32>
    %58 = tpu.matmul %52, %14, %cst_27 {dimension_numbers = #tpu.dot_dimension_numbers<[1], [0], [0], [1], [0, 0, 1, 1], [], []>} : vector<2x256xf32>, vector<256x256xf32>, vector<2x256xf32> -> vector<2x256xf32>
    %59 = arith.addf %57, %58 : vector<2x256xf32>
    %60 = math.tanh %59 : vector<2x256xf32>
    %c0_28 = arith.constant 0 : index
    %c5 = arith.constant 5 : index
    %c0_29 = arith.constant 0 : index
    %61 = vector.load %arg9[%c0_28, %c5, %c0_29] : memref<2x8x256xf32, #tpu.memory_space<vmem>>, vector<2x1x256xf32>
    %62 = vector.shape_cast %61 : vector<2x1x256xf32> to vector<2x256xf32>
    %63 = vector.shape_cast %60 : vector<2x256xf32> to vector<2x1x256xf32>
    tpu.vector_store %arg9[%c0_28, %c5, %c0_29], %63 {strides = array<i32>} : memref<2x8x256xf32, #tpu.memory_space<vmem>>, vector<2x1x256xf32>,
    %64 = vector.extract_strided_slice %13 {offsets = [0, 6, 0], sizes = [2, 1, 256], strides = [1, 1, 1]} : vector<2x8x256xf32> to vector<2x1x256xf32>
    %65 = vector.shape_cast %64 : vector<2x1x256xf32> to vector<2x256xf32>
    %cst_30 = arith.constant dense<0.000000e+00> : vector<2x256xf32>
    %66 = tpu.matmul %60, %14, %cst_30 {dimension_numbers = #tpu.dot_dimension_numbers<[1], [0], [0], [1], [0, 0, 1, 1], [], []>} : vector<2x256xf32>, vector<256x256xf32>, vector<2x256xf32> -> vector<2x256xf32>
    %67 = arith.addf %65, %66 : vector<2x256xf32>
    %68 = math.tanh %67 : vector<2x256xf32>
    %c0_31 = arith.constant 0 : index
    %c6 = arith.constant 6 : index
    %c0_32 = arith.constant 0 : index
    %69 = vector.load %arg9[%c0_31, %c6, %c0_32] : memref<2x8x256xf32, #tpu.memory_space<vmem>>, vector<2x1x256xf32>
    %70 = vector.shape_cast %69 : vector<2x1x256xf32> to vector<2x256xf32>
    %71 = vector.shape_cast %68 : vector<2x256xf32> to vector<2x1x256xf32>
    tpu.vector_store %arg9[%c0_31, %c6, %c0_32], %71 {strides = array<i32>} : memref<2x8x256xf32, #tpu.memory_space<vmem>>, vector<2x1x256xf32>,
    %72 = vector.extract_strided_slice %13 {offsets = [0, 7, 0], sizes = [2, 1, 256], strides = [1, 1, 1]} : vector<2x8x256xf32> to vector<2x1x256xf32>
    %73 = vector.shape_cast %72 : vector<2x1x256xf32> to vector<2x256xf32>
    %cst_33 = arith.constant dense<0.000000e+00> : vector<2x256xf32>
    %74 = tpu.matmul %68, %14, %cst_33 {dimension_numbers = #tpu.dot_dimension_numbers<[1], [0], [0], [1], [0, 0, 1, 1], [], []>} : vector<2x256xf32>, vector<256x256xf32>, vector<2x256xf32> -> vector<2x256xf32>
    %75 = arith.addf %73, %74 : vector<2x256xf32>
    %76 = math.tanh %75 : vector<2x256xf32>
    %c0_34 = arith.constant 0 : index
    %c7 = arith.constant 7 : index
    %c0_35 = arith.constant 0 : index
    %77 = vector.load %arg9[%c0_34, %c7, %c0_35] : memref<2x8x256xf32, #tpu.memory_space<vmem>>, vector<2x1x256xf32>
    %78 = vector.shape_cast %77 : vector<2x1x256xf32> to vector<2x256xf32>
    %79 = vector.shape_cast %76 : vector<2x256xf32> to vector<2x1x256xf32>
    tpu.vector_store %arg9[%c0_34, %c7, %c0_35], %79 {strides = array<i32>} : memref<2x8x256xf32, #tpu.memory_space<vmem>>, vector<2x1x256xf32>,
    %c0_36 = arith.constant 0 : index
    %c0_37 = arith.constant 0 : index
    %80 = vector.load %arg8[%c0_36, %c0_37] : memref<2x256xf32, #tpu.memory_space<vmem>>, vector<2x256xf32>
    tpu.vector_store %arg8[%c0_36, %c0_37], %76 {strides = array<i32>} : memref<2x256xf32, #tpu.memory_space<vmem>>, vector<2x256xf32>,
    %c0_38 = arith.constant 0 : index
    %c0_39 = arith.constant 0 : index
    %c0_40 = arith.constant 0 : index
    %81 = vector.load %arg9[%c0_38, %c0_39, %c0_40] : memref<2x8x256xf32, #tpu.memory_space<vmem>>, vector<2x8x256xf32>
    %82 = vector.shape_cast %81 : vector<2x8x256xf32> to vector<16x256xf32>
    %c0_41 = arith.constant 0 : index
    %c0_42 = arith.constant 0 : index
    %83 = vector.load %arg5[%c0_41, %c0_42] : memref<256x128xf32, #tpu.memory_space<vmem>>, vector<256x128xf32>
    %cst_43 = arith.constant dense<0.000000e+00> : vector<16x128xf32>
    %84 = tpu.matmul %82, %83, %cst_43 {dimension_numbers = #tpu.dot_dimension_numbers<[1], [0], [0], [1], [0, 0, 1, 1], [], []>} : vector<16x256xf32>, vector<256x128xf32>, vector<16x128xf32> -> vector<16x128xf32>
    %c0_44 = arith.constant 0 : index
    %c0_45 = arith.constant 0 : index
    %85 = vector.load %arg6[%c0_44, %c0_45] : memref<1x128xf32, #tpu.memory_space<vmem>>, vector<1x128xf32>
    %86 = vector.broadcast %85 : vector<1x128xf32> to vector<16x128xf32>
    %87 = arith.addf %84, %86 : vector<16x128xf32>
    %88 = vector.shape_cast %87 : vector<16x128xf32> to vector<2x8x128xf32>
    %c0_46 = arith.constant 0 : index
    %c0_47 = arith.constant 0 : index
    %c0_48 = arith.constant 0 : index
    %89 = vector.load %arg7[%c0_46, %c0_47, %c0_48] : memref<2x8x128xf32, #tpu.memory_space<vmem>>, vector<2x8x128xf32>
    tpu.vector_store %arg7[%c0_46, %c0_47, %c0_48], %88 {strides = array<i32>} : memref<2x8x128xf32, #tpu.memory_space<vmem>>, vector<2x8x128xf32>,
    return
  }
}

</mosaic_0001>

<bundles_post_ra>
// kernel: simple_rnn_forward.1
= control target key start
LH: loop header
LB: loop body
LE: loop exit
PB: predicated region body
PF: predicated region fallthrough
CT: control target
= control target key end

     0   :  { %14 = vsyncpa [#allocation4], 0  ;;  %s3222_s0 = inlined_call_operand.vmem [shape: s32[16,1], index: 0, kind: input, shape index: {}]   ;;  %s3223_s1 = inlined_call_operand.hbm [shape: f32[128,128], index: 1, kind: input, shape index: {}]   ;;  %s3224_s2 = inlined_call_operand.hbm [shape: f32[128,256], index: 2, kind: input, shape index: {}]   ;;  %s3225_s3 = inlined_call_operand.hbm [shape: f32[256,256], index: 3, kind: input, shape index: {}]   ;;  %s3226_s4 = inlined_call_operand.vmem [shape: f32[1,256], index: 4, kind: input, shape index: {}]   ;;  %s3227_s5 = inlined_call_operand.hbm [shape: f32[256,128], index: 5, kind: input, shape index: {}]   ;;  %s3228_s6 = inlined_call_operand.vmem [shape: f32[1,128], index: 6, kind: input, shape index: {}]   ;;  %s3229_s7 = inlined_call_operand.hbm [shape: f32[2,8,128], index: 7, kind: output, shape index: {0}]   ;;  %s3230_s8 = inlined_call_operand.hbm [shape: f32[2,256], index: 8, kind: output, shape index: {1}]  }
   0x1   :  { %15 = vsyncpa [#allocation7], 0 }
   0x2   :  { %16 = vsyncpa [#allocation10], 0 }
   0x3   :  { %17 = vsyncpa [#allocation5], 0 }
   0x4   :  { %18 = vsyncpa [#allocation13], 0  ;;  %s2602_s27 = smov [#allocation6]   ;;  %s2460_s9 = scalar_lea.hbm %s3224_s2, 4096 }
   0x5   :  { %s38_s28 = sshll.u32 %s2602_s27, 4  ;;  %p2461_p0 = scmp.ne.s32.totalorder %s3224_s2, %s2460_s9  ;;  %s39_s28 = int_to_ptr.vmem [resolvable:$true] %s38_s28 }
   0x6   :  { %p2464_p1 = scmp.lt.u32.totalorder %s2460_s9, %s3224_s2 }
   0x8   :  { %p2466_p2 = pnand %p2464_p1, %p2461_p0 }
   0xa   :  { %2469 = shalt.err (!%p2466_p2)
}
   0xb   :  { %s2470_s14 = scalar_lea.vmem %s39_s28, 4096  ;;  %p2475_p4 = scmp.lt.s32.totalorder %s39_s28, %s39_s28 }
   0xc   :  { %p2471_p3 = scmp.ne.s32.totalorder %s39_s28, %s2470_s14  ;;  %p2476_p5 = scmp.lt.s32.totalorder %s2470_s14, %s2470_s14 }
   0xe   :  { %p2477_p6 = por %p2476_p5, %p2475_p4 }
  0x10   :  { %p2478_p7 = pnand %p2477_p6, %p2471_p3 }
  0x12   :  { %2481 = shalt.err (!%p2478_p7)
}
  0x13   :  { %s2603_s15 = smov 256   ;;  %s2604_s16 = smov 16  }
  0x14   :  { %44 = dma.hbm_to_vmem [thread:$0]  %s3224_s2, 4096, %s39_s28, [#allocation7], %s2603_s15, %s2603_s15, %s2604_s16  }
  0x15   :  { %s2605_s19 = smov [#allocation3]   ;;  %s2482_s23 = scalar_lea.hbm %s3223_s1, 2048 }
  0x16   :  { %s26_s20 = sshll.u32 %s2605_s19, 4  ;;  %p2483_p8 = scmp.ne.s32.totalorder %s3223_s1, %s2482_s23  ;;  %s27_s20 = int_to_ptr.vmem [resolvable:$true] %s26_s20 }
  0x17   :  { %p2486_p9 = scmp.lt.u32.totalorder %s2482_s23, %s3223_s1 }
  0x19   :  { %p2488_p10 = pnand %p2486_p9, %p2483_p8 }
  0x1b   :  { %2491 = shalt.err (!%p2488_p10)
}
  0x1c   :  { %s2492_s29 = scalar_lea.vmem %s27_s20, 2048  ;;  %p2497_p12 = scmp.lt.s32.totalorder %s27_s20, %s27_s20 }
  0x1d   :  { %p2493_p11 = scmp.ne.s32.totalorder %s27_s20, %s2492_s29  ;;  %p2498_p13 = scmp.lt.s32.totalorder %s2492_s29, %s2492_s29 }
  0x1f   :  { %p2499_p0 = por %p2498_p13, %p2497_p12 }
  0x21   :  { %p2500_p1 = pnand %p2499_p0, %p2493_p11 }
  0x23   :  { %2503 = shalt.err (!%p2500_p1)
}
  0x24   :  { %s2606_s2 = smov 128   ;;  %s2607_s28 = smov 8  }
  0x25   :  { %32 = dma.hbm_to_vmem [thread:$0]  %s3223_s1, 2048, %s27_s20, [#allocation4], %s2606_s2, %s2606_s2, %s2607_s28  }
  0x26   :  { %s2608_s10 = smov [#allocation8]   ;;  %s2609_s12 = smov [#allocation9]  }
  0x27   :  { %s50_s11 = sshll.u32 %s2608_s10, 4  ;;  %s64_s13 = sshll.u32 %s2609_s12, 4  ;;  %s51_s11 = int_to_ptr.vmem [resolvable:$true] %s50_s11  ;;  %s2692_s13 = int_to_ptr.vmem [resolvable:$true] %s64_s13 }
  0x28   :  { %s2504_s18 = scalar_lea.hbm %s3225_s3, 8192 }
  0x29   :  { %p2505_p2 = scmp.ne.s32.totalorder %s3225_s3, %s2504_s18  ;;  %p2508_p3 = scmp.lt.u32.totalorder %s2504_s18, %s3225_s3 }
  0x2b   :  { %p2510_p4 = pnand %p2508_p3, %p2505_p2 }
  0x2d   :  { %2513 = shalt.err (!%p2510_p4)
}
  0x2e   :  { %s2514_s1 = scalar_lea.vmem %s51_s11, 8192  ;;  %p2519_p6 = scmp.lt.s32.totalorder %s51_s11, %s51_s11 }
  0x2f   :  { %p2515_p5 = scmp.ne.s32.totalorder %s51_s11, %s2514_s1  ;;  %p2520_p7 = scmp.lt.s32.totalorder %s2514_s1, %s2514_s1 }
  0x31   :  { %p2521_p8 = por %p2520_p7, %p2519_p6 }
  0x33   :  { %p2522_p9 = pnand %p2521_p8, %p2515_p5 }
  0x35   :  { %2525 = shalt.err (!%p2522_p9)
}
  0x36   :  { %56 = dma.hbm_to_vmem [thread:$0]  %s3225_s3, 8192, %s51_s11, [#allocation7], %s2603_s15, %s2603_s15, %s2604_s16  }
  0x37   :  { %s2526_s27 = scalar_lea.hbm %s3227_s5, 4096 }
  0x38   :  { %p2527_p10 = scmp.ne.s32.totalorder %s3227_s5, %s2526_s27  ;;  %p2530_p11 = scmp.lt.u32.totalorder %s2526_s27, %s3227_s5 }
  0x3a   :  { %p2532_p12 = pnand %p2530_p11, %p2527_p10 }
  0x3c   :  { %2535 = shalt.err (!%p2532_p12)
}
  0x3d   :  { %s2536_s12 = scalar_lea.vmem %s2692_s13, 4096  ;;  %p2541_p0 = scmp.lt.s32.totalorder %s2692_s13, %s2692_s13 }
  0x3e   :  { %p2537_p13 = scmp.ne.s32.totalorder %s2692_s13, %s2536_s12  ;;  %p2542_p1 = scmp.lt.s32.totalorder %s2536_s12, %s2536_s12 }
  0x40   :  { %p2543_p2 = por %p2542_p1, %p2541_p0 }
  0x42   :  { %p2544_p3 = pnand %p2543_p2, %p2537_p13 }
  0x44   :  { %2547 = shalt.err (!%p2544_p3)
}
  0x45   :  { %70 = dma.hbm_to_vmem [thread:$0]  %s3227_s5, 4096, %s2692_s13, [#allocation10], %s2606_s2, %s2606_s2, %s2607_s28  }
  0x46   :  { %2592 = dma.done.wait [#allocation4], 2048  }
  0x47   :  { %2593 = vsyncadd [#allocation4], 4294965248 }
  0x48   :  { %2594 = dma.done.wait [#allocation7], 12288  }
  0x49   :  { %2595 = vsyncadd [#allocation7], 4294955008 }
  0x4a   :  { %2596 = dma.done.wait [#allocation10], 4096  }
  0x4b   :  { %2597 = vsyncadd [#allocation10], 4294963200  ;;  %v2610_v0 = vmov 0   ;;  %v85_v1 = vld [vmem:[%s3222_s0] sm:$0xff]  ;;  %v101_v2 = vld [vmem:[#allocation3] sm:$0xff]  ;;  %vm510_vm3 = vcmask 1041409  }
  0x4c   :  { %2395 = vset.pattern.permute.xlu0 %v2610_v0  ;;  %v102_v3 = vld [vmem:[#allocation3 + $0x8] sm:$0xff]  ;;  %v103_v4 = vld [vmem:[#allocation3 + $0x10] sm:$0xff]  ;;  %v104_v5 = vld [vmem:[#allocation3 + $0x18] sm:$0xff]  ;;  %vm1515_vm4 = vcmask 1043459   ;;  %vm1517_vm5 = vcmask 1045509   ;;  %vm1519_vm6 = vcmask 1047559  }
  0x4d   :  { %90 = vperm.xlu0 %2395, %v85_v1   ;;  %v86_v6 = vld [vmem:[%s3222_s0 + $0x8] sm:$0xff]  ;;  %v1772_v7 = vpack.c.bf16 %v102_v3, %v101_v2  ;;  %v1776_v8 = vpack.c.bf16 %v104_v5, %v103_v4  ;;  %v105_v9 = vld [vmem:[#allocation3 + $0x20] sm:$0xff]  ;;  %v106_v10 = vld [vmem:[#allocation3 + $0x28] sm:$0xff] }
  0x4e   :  { %v107_v11 = vld [vmem:[#allocation3 + $0x30] sm:$0xff]  ;;  %v108_v12 = vld [vmem:[#allocation3 + $0x38] sm:$0xff]  ;;  %v1780_v13 = vpack.c.bf16 %v106_v10, %v105_v9  ;;  %v314_v14 = vld [vmem:[#allocation8 + $0x8] sm:$0xff] }
  0x4f   :  { %1773 = vmatprep.subr.bf16.mxu1 %v1772_v7  ;;  %v316_v15 = vld [vmem:[#allocation8 + $0x18] sm:$0xff]  ;;  %v313_v16 = vld [vmem:[#allocation8] sm:$0xff]  ;;  %v315_v18 = vld [vmem:[#allocation8 + $0x10] sm:$0xff]  ;;  %v1784_v27 = vpack.c.bf16 %v108_v12, %v107_v11 }
  0x50   :  { %1775 = vmatpush3.bf16.msra.mxu1 %v1772_v7  ;;  %v2735_v17 = vpack.c.bf16 %v316_v15, %v314_v14  ;;  %v318_v19 = vld [vmem:[#allocation8 + $0x28] sm:$0xff]  ;;  %v320_v20 = vld [vmem:[#allocation8 + $0x38] sm:$0xff]  ;;  %v2737_v21 = vpack.c.bf16 %v315_v18, %v313_v16  ;;  %v317_v23 = vld [vmem:[#allocation8 + $0x20] sm:$0xff] }
  0x51   :  { %93 = vperm.xlu0 %2395, %v86_v6   ;;  %1777 = vmatprep.subr.bf16.mxu1 %v1776_v8  ;;  %v2739_v22 = vpack.c.bf16 %v320_v20, %v318_v19  ;;  %v319_v24 = vld [vmem:[#allocation8 + $0x30] sm:$0xff]  ;;  %v322_v25 = vld [vmem:[#allocation8 + $0x48] sm:$0xff]  ;;  %v324_v26 = vld [vmem:[#allocation8 + $0x58] sm:$0xff] }
  0x52   :  { %1837 = vmatprep.subr.bf16.mxu0 %v2735_v17  ;;  %v109_v28 = vld [vmem:[#allocation3 + $0x40] sm:$0xff]  ;;  %v2743_v29 = vpack.c.bf16 %v319_v24, %v317_v23  ;;  %v110_v30 = vld [vmem:[#allocation3 + $0x48] sm:$0xff]  ;;  %v2746_v31 = vpack.c.bf16 %v324_v26, %v322_v25  ;;  %v323_v33 = vld [vmem:[#allocation8 + $0x50] sm:$0xff] }
  0x53   :  { %1839 = vmatpush1.bf16.msra.mxu0 %v2737_v21  ;;  %v321_v32 = vld [vmem:[#allocation8 + $0x40] sm:$0xff]  ;;  %v326_v34 = vld [vmem:[#allocation8 + $0x68] sm:$0xff]  ;;  %v328_v35 = vld [vmem:[#allocation8 + $0x78] sm:$0xff]  ;;  %v1788_v36 = vpack.c.bf16 %v110_v30, %v109_v28 }
  0x54   :  { %1779 = vmatpush3.bf16.msra.mxu1 %v1776_v8  ;;  %1841 = vmatprep.subr.bf16.mxu0 %v2739_v22  ;;  %v111_v37 = vld [vmem:[#allocation3 + $0x50] sm:$0xff]  ;;  %v2749_v38 = vpack.c.bf16 %v323_v33, %v321_v32  ;;  %v112_v39 = vld [vmem:[#allocation3 + $0x58] sm:$0xff]  ;;  %v2752_v40 = vpack.c.bf16 %v328_v35, %v326_v34  ;;  %v325_v41 = vld [vmem:[#allocation8 + $0x60] sm:$0xff] }
  0x55   :  { %1781 = vmatprep.subr.bf16.mxu1 %v1780_v13  ;;  %v327_v42 = vld [vmem:[#allocation8 + $0x70] sm:$0xff]  ;;  %v330_v43 = vld [vmem:[#allocation8 + $0x88] sm:$0xff]  ;;  %v332_v44 = vld [vmem:[#allocation8 + $0x98] sm:$0xff]  ;;  %v1792_v45 = vpack.c.bf16 %v112_v39, %v111_v37 }
  0x56   :  { %v113_v46 = vld [vmem:[#allocation3 + $0x60] sm:$0xff]  ;;  %v2755_v47 = vpack.c.bf16 %v327_v42, %v325_v41  ;;  %v114_v48 = vld [vmem:[#allocation3 + $0x68] sm:$0xff]  ;;  %v2758_v49 = vpack.c.bf16 %v332_v44, %v330_v43  ;;  %v331_v51 = vld [vmem:[#allocation8 + $0x90] sm:$0xff] }
  0x57   :  { %1843 = vmatpush1.bf16.msra.mxu0 %v2743_v29  ;;  %v329_v50 = vld [vmem:[#allocation8 + $0x80] sm:$0xff]  ;;  %v334_v52 = vld [vmem:[#allocation8 + $0xa8] sm:$0xff]  ;;  %v336_v53 = vld [vmem:[#allocation8 + $0xb8] sm:$0xff]  ;;  %v1796_v54 = vpack.c.bf16 %v114_v48, %v113_v46 }
  0x58   :  { %1783 = vmatpush3.bf16.msra.mxu1 %v1780_v13  ;;  %1845 = vmatprep.subr.bf16.mxu0 %v2746_v31  ;;  %v115_v55 = vld [vmem:[#allocation3 + $0x70] sm:$0xff]  ;;  %v2761_v56 = vpack.c.bf16 %v331_v51, %v329_v50  ;;  %v116_v57 = vld [vmem:[#allocation3 + $0x78] sm:$0xff]  ;;  %v2764_v58 = vpack.c.bf16 %v336_v53, %v334_v52  ;;  %v333_v59 = vld [vmem:[#allocation8 + $0xa0] sm:$0xff] }
  0x59   :  { %1785 = vmatprep.subr.bf16.mxu1 %v1784_v27  ;;  %v335_v60 = vld [vmem:[#allocation8 + $0xb0] sm:$0xff]  ;;  %v338_v61 = vld [vmem:[#allocation8 + $0xc8] sm:$0xff]  ;;  %v340_v62 = vld [vmem:[#allocation8 + $0xd8] sm:$0xff]  ;;  %v1800_v63 = vpack.c.bf16 %v116_v57, %v115_v55 }
  0x5a   :  { %v2767_v0 = vpack.c.bf16 %v335_v60, %v333_v59  ;;  %v337_v1 = vld [vmem:[#allocation8 + $0xc0] sm:$0xff]  ;;  %v2770_v2 = vpack.c.bf16 %v340_v62, %v338_v61  ;;  %v339_v3 = vld [vmem:[#allocation8 + $0xd0] sm:$0xff]  ;;  %v193_v4 = vld [vmem:[#allocation6 + $0x8] sm:$0xff] }
  0x5b   :  { %1847 = vmatpush1.bf16.msra.mxu0 %v2749_v38  ;;  %v195_v5 = vld [vmem:[#allocation6 + $0x18] sm:$0xff]  ;;  %v342_v6 = vld [vmem:[#allocation8 + $0xe8] sm:$0xff]  ;;  %v2773_v8 = vpack.c.bf16 %v339_v3, %v337_v1  ;;  %v341_v11 = vld [vmem:[#allocation8 + $0xe0] sm:$0xff] }
  0x5c   :  { %1787 = vmatpush3.bf16.msra.mxu1 %v1784_v27  ;;  %1849 = vmatprep.subr.bf16.mxu0 %v2752_v40  ;;  %v344_v7 = vld [vmem:[#allocation8 + $0xf8] sm:$0xff]  ;;  %v1804_v9 = vpack.c.bf16 %v195_v5, %v193_v4  ;;  %v343_v12 = vld [vmem:[#allocation8 + $0xf0] sm:$0xff]  ;;  %v346_v13 = vld [vmem:[#allocation8 + $0x108] sm:$0xff]  ;;  %v87_v5 = vlaneseq }
  0x5d   :  { %1789 = vmatprep.subr.bf16.mxu1 %v1788_v36  ;;  %v2776_v10 = vpack.c.bf16 %v344_v7, %v342_v6  ;;  %v348_v14 = vld [vmem:[#allocation8 + $0x118] sm:$0xff]  ;;  %v2779_v15 = vpack.c.bf16 %v343_v12, %v341_v11  ;;  %v345_v18 = vld [vmem:[#allocation8 + $0x100] sm:$0xff]  ;;  %v347_v19 = vld [vmem:[#allocation8 + $0x110] sm:$0xff] }
  0x5e   :  { %v2782_v16 = vpack.c.bf16 %v348_v14, %v346_v13  ;;  %v350_v20 = vld [vmem:[#allocation8 + $0x128] sm:$0xff]  ;;  %v352_v23 = vld [vmem:[#allocation8 + $0x138] sm:$0xff]  ;;  %v2785_v24 = vpack.c.bf16 %v347_v19, %v345_v18  ;;  %v349_v26 = vld [vmem:[#allocation8 + $0x120] sm:$0xff]  ;;  %v88_v6 = vand.u32 127, %v87_v5  ;;  %v2611_v14 = vmov 1.0  }
  0x5f   :  { %1851 = vmatpush1.bf16.msra.mxu0 %v2755_v47  ;;  %v2788_v25 = vpack.c.bf16 %v352_v23, %v350_v20  ;;  %v351_v27 = vld [vmem:[#allocation8 + $0x130] sm:$0xff]  ;;  %v354_v28 = vld [vmem:[#allocation8 + $0x148] sm:$0xff]  ;;  %v356_v30 = vld [vmem:[#allocation8 + $0x158] sm:$0xff]  ;;  %vm2923_vm2 = vcmp.lt.s32.totalorder %v87_v5, 256 }
  0x60   :  { %1791 = vmatpush3.bf16.msra.mxu1 %v1788_v36  ;;  %1853 = vmatprep.subr.bf16.mxu0 %v2758_v49  ;;  %v2791_v32 = vpack.c.bf16 %v351_v27, %v349_v26  ;;  %v2794_v33 = vpack.c.bf16 %v356_v30, %v354_v28  ;;  %v353_v34 = vld [vmem:[#allocation8 + $0x140] sm:$0xff]  ;;  %v355_v35 = vld [vmem:[#allocation8 + $0x150] sm:$0xff]  ;;  %v358_v36 = vld [vmem:[#allocation8 + $0x168] sm:$0xff] }
  0x61   :  { %1793 = vmatprep.subr.bf16.mxu1 %v1792_v45  ;;  %v360_v37 = vld [vmem:[#allocation8 + $0x178] sm:$0xff]  ;;  %v2797_v39 = vpack.c.bf16 %v355_v35, %v353_v34  ;;  %v357_v42 = vld [vmem:[#allocation8 + $0x160] sm:$0xff]  ;;  %v359_v43 = vld [vmem:[#allocation8 + $0x170] sm:$0xff] }
  0x62   :  { %v2800_v41 = vpack.c.bf16 %v360_v37, %v358_v36  ;;  %v362_v44 = vld [vmem:[#allocation8 + $0x188] sm:$0xff]  ;;  %v2803_v46 = vpack.c.bf16 %v359_v43, %v357_v42  ;;  %v361_v50 = vld [vmem:[#allocation8 + $0x180] sm:$0xff]  ;;  %v363_v51 = vld [vmem:[#allocation8 + $0x190] sm:$0xff] }
  0x63   :  { %1855 = vmatpush1.bf16.msra.mxu0 %v2761_v56  ;;  %v366_v52 = vld [vmem:[#allocation8 + $0x1a8] sm:$0xff]  ;;  %v368_v53 = vld [vmem:[#allocation8 + $0x1b8] sm:$0xff]  ;;  %v365_v57 = vld [vmem:[#allocation8 + $0x1a0] sm:$0xff] }
  0x64   :  { %1795 = vmatpush3.bf16.msra.mxu1 %v1792_v45  ;;  %1857 = vmatprep.subr.bf16.mxu0 %v2764_v58  ;;  %v364_v45 = vld [vmem:[#allocation8 + $0x198] sm:$0xff]  ;;  %v2812_v55 = vpack.c.bf16 %v368_v53, %v366_v52  ;;  %v367_v59 = vld [vmem:[#allocation8 + $0x1b0] sm:$0xff]  ;;  %v370_v60 = vld [vmem:[#allocation8 + $0x1c8] sm:$0xff] }
  0x65   :  { %1797 = vmatprep.subr.bf16.mxu1 %v1796_v54  ;;  %v2806_v48 = vpack.c.bf16 %v364_v45, %v362_v44  ;;  %v372_v61 = vld [vmem:[#allocation8 + $0x1d8] sm:$0xff]  ;;  %v2815_v62 = vpack.c.bf16 %v367_v59, %v365_v57  ;;  %v369_v1 = vld [vmem:[#allocation8 + $0x1c0] sm:$0xff]  ;;  %v371_v3 = vld [vmem:[#allocation8 + $0x1d0] sm:$0xff] }
  0x66   :  { %v2821_v4 = vpack.c.bf16 %v371_v3, %v369_v1  ;;  %v194_v11 = vld [vmem:[#allocation6 + $0x10] sm:$0xff]  ;;  %v197_v12 = vld [vmem:[#allocation6 + $0x28] sm:$0xff]  ;;  %v199_v13 = vld [vmem:[#allocation6 + $0x38] sm:$0xff] }
  0x67   :  { %1859 = vmatpush1.bf16.msra.mxu0 %v2767_v0  ;;  %v1808_v20 = vpack.c.bf16 %v199_v13, %v197_v12  ;;  %v196_v23 = vld [vmem:[#allocation6 + $0x20] sm:$0xff]  ;;  %v198_v26 = vld [vmem:[#allocation6 + $0x30] sm:$0xff]  ;;  %v201_v27 = vld [vmem:[#allocation6 + $0x48] sm:$0xff] }
  0x68   :  { %1799 = vmatpush3.bf16.msra.mxu1 %v1796_v54  ;;  %1861 = vmatprep.subr.bf16.mxu0 %v2770_v2  ;;  %v2809_v54 = vpack.c.bf16 %v363_v51, %v361_v50  ;;  %v203_v28 = vld [vmem:[#allocation6 + $0x58] sm:$0xff]  ;;  %v1810_v30 = vpack.c.bf16 %v198_v26, %v196_v23  ;;  %v200_v35 = vld [vmem:[#allocation6 + $0x40] sm:$0xff]  ;;  %v202_v36 = vld [vmem:[#allocation6 + $0x50] sm:$0xff] }
  0x69   :  { %1801 = vmatprep.subr.bf16.mxu1 %v1800_v63  ;;  %v1812_v34 = vpack.c.bf16 %v203_v28, %v201_v27  ;;  %v205_v37 = vld [vmem:[#allocation6 + $0x68] sm:$0xff]  ;;  %v207_v42 = vld [vmem:[#allocation6 + $0x78] sm:$0xff]  ;;  %v1814_v43 = vpack.c.bf16 %v202_v36, %v200_v35  ;;  %v204_v45 = vld [vmem:[#allocation6 + $0x60] sm:$0xff] }
  0x6a   :  { %v1816_v44 = vpack.c.bf16 %v207_v42, %v205_v37  ;;  %v206_v50 = vld [vmem:[#allocation6 + $0x70] sm:$0xff]  ;;  %v209_v51 = vld [vmem:[#allocation6 + $0x88] sm:$0xff]  ;;  %v211_v52 = vld [vmem:[#allocation6 + $0x98] sm:$0xff] }
  0x6b   :  { %1863 = vmatpush1.bf16.msra.mxu0 %v2773_v8  ;;  %v1818_v53 = vpack.c.bf16 %v206_v50, %v204_v45  ;;  %v1820_v57 = vpack.c.bf16 %v211_v52, %v209_v51  ;;  %v208_v59 = vld [vmem:[#allocation6 + $0x80] sm:$0xff]  ;;  %v215_v1 = vld [vmem:[#allocation6 + $0xb8] sm:$0xff]  ;;  %v374_v35 = vld [vmem:[#allocation8 + $0x1e8] sm:$0xff]  ;;  %v2612_v45 = vmov 0.0  }
  0x6c   :  { %1803 = vmatpush3.bf16.msra.mxu1 %v1800_v63  ;;  %1865 = vmatprep.subr.bf16.mxu0 %v2776_v10  ;;  %v2818_v63 = vpack.c.bf16 %v372_v61, %v370_v60  ;;  %v210_v60 = vld [vmem:[#allocation6 + $0x90] sm:$0xff]  ;;  %v213_v61 = vld [vmem:[#allocation6 + $0xa8] sm:$0xff]  ;;  %v219_v12 = vld [vmem:[#allocation6 + $0xd8] sm:$0xff] }
  0x6d   :  { %1805 = vmatprep.subr.bf16.mxu1 %v1804_v9  ;;  %v192_v9 = vld [vmem:[#allocation6] sm:$0xff]  ;;  %v1822_v3 = vpack.c.bf16 %v210_v60, %v208_v59  ;;  %v223_v23 = vld [vmem:[#allocation6 + $0xf8] sm:$0xff]  ;;  %441 = vmatprep.mubr.f32.mxu0 %v2612_v45  ;;  %v224_v60 = vld [vmem:[%s3226_s4] sm:$0x3]  ;;  %s2615_s4 = smov [#allocation12]  }
  0x6e   :  { %v1806_v18 = vpack.c.bf16 %v194_v11, %v192_v9  ;;  %v214_v9 = vld [vmem:[#allocation6 + $0xb0] sm:$0xff]  ;;  %v217_v11 = vld [vmem:[#allocation6 + $0xc8] sm:$0xff]  ;;  %v220_v28 = vld [vmem:[#allocation6 + $0xe0] sm:$0xff]  ;;  %s1661_s13 = sshll.u32 %s2615_s4, 4  ;;  %s1662_s13 = int_to_ptr.vmem [resolvable:$true] %s1661_s13 }
  0x6f   :  { %1867 = vmatpush1.bf16.msra.mxu0 %v2779_v15  ;;  %v376_v36 = vld [vmem:[#allocation8 + $0x1f8] sm:$0xff]  ;;  %v373_v42 = vld [vmem:[#allocation8 + $0x1e0] sm:$0xff]  ;;  %s2548_s18 = scalar_lea.vmem %s1662_s13, 64  ;;  %p2553_p5 = scmp.lt.s32.totalorder %s1662_s13, %s1662_s13 }
  0x70   :  { %1869 = vmatprep.subr.bf16.mxu0 %v2782_v16  ;;  %v2827_v37 = vpack.c.bf16 %v376_v36, %v374_v35  ;;  %p2549_p4 = scmp.ne.s32.totalorder %s1662_s13, %s2548_s18  ;;  %p2554_p6 = scmp.lt.s32.totalorder %s2548_s18, %s2548_s18 }
  0x72   :  { %p2555_p7 = por %p2554_p6, %p2553_p5 }
  0x73   :  { %1871 = vmatpush1.bf16.msra.mxu0 %v2785_v24 }
  0x74   :  { %1873 = vmatprep.subr.bf16.mxu0 %v2788_v25  ;;  %p2556_p8 = pnand %p2555_p7, %p2549_p4 }
  0x77   :  { %1875 = vmatpush1.bf16.msra.mxu0 %v2791_v32 }
  0x78   :  { %1877 = vmatprep.subr.bf16.mxu0 %v2794_v33 }
  0x7b   :  { %1879 = vmatpush1.bf16.msra.mxu0 %v2797_v39 }
  0x7c   :  { %1881 = vmatprep.subr.bf16.mxu0 %v2800_v41 }
  0x7f   :  { %1883 = vmatpush1.bf16.msra.mxu0 %v2803_v46 }
  0x80   :  { %1885 = vmatprep.subr.bf16.mxu0 %v2806_v48 }
  0x83   :  { %1887 = vmatpush1.bf16.msra.mxu0 %v2809_v54 }
  0x84   :  { %1889 = vmatprep.subr.bf16.mxu0 %v2812_v55 }
  0x87   :  { %1891 = vmatpush1.bf16.msra.mxu0 %v2815_v62 }
  0x88   :  { %1893 = vmatprep.subr.bf16.mxu0 %v2818_v63 }
  0x8b   :  { %1895 = vmatpush1.bf16.msra.mxu0 %v2821_v4 }
  0x8c   :  { %1897 = vmatprep.subr.bf16.mxu0 %v2827_v37 }
  0xcc   :  { %v91_v7 = vpop.permute.xlu0 %90 }
  0xcd   :  { %vm95_vm0 = vcmp.eq.s32.totalorder %v88_v6, %v91_v7  ;;  %v212_v7 = vld [vmem:[#allocation6 + $0xa0] sm:$0xff] }
  0xce   :  { %1769 = vmatprep.mubr.msk.f32.mxu1 %vm95_vm0, %v2611_v14  ;;  %v1826_v13 = vpack.c.bf16 %v214_v9, %v212_v7 }
  0xd0   :  { %v94_v19 = vpop.permute.xlu0 %93 }
  0xd1   :  { %vm96_vm1 = vcmp.eq.s32.totalorder %v88_v6, %v94_v19  ;;  %v1824_v6 = vpack.c.bf16 %v215_v1, %v213_v61  ;;  %v218_v19 = vld [vmem:[#allocation6 + $0xd0] sm:$0xff] }
  0xd2   :  { %1770 = vmatmul.mubr.msk.f32.vlgmr.msra.gmra.mrb[0].mxu1 %vm96_vm1, %v2611_v14  ;;  %v1828_v14 = vpack.c.bf16 %v219_v12, %v217_v11 }
  0xd3   :  { %1807 = vmatpush1.bf16.msra.mxu1 %v1806_v18  ;;  %v216_v18 = vld [vmem:[#allocation6 + $0xc0] sm:$0xff]  ;;  %300 = vmatprep.mubr.f32.mxu1 %v2612_v45 }
  0xd4   :  { %1809 = vmatprep.subr.bf16.mxu1 %v1808_v20  ;;  %v221_v20 = vld [vmem:[#allocation6 + $0xe8] sm:$0xff]  ;;  %v1830_v26 = vpack.c.bf16 %v218_v19, %v216_v18 }
  0xd5   :  { %v1832_v27 = vpack.c.bf16 %v223_v23, %v221_v20 }
  0xd7   :  { %1811 = vmatpush1.bf16.msra.mxu1 %v1810_v30  ;;  %v222_v30 = vld [vmem:[#allocation6 + $0xf0] sm:$0xff] }
  0xd8   :  { %1813 = vmatprep.subr.bf16.mxu1 %v1812_v34  ;;  %v1834_v34 = vpack.c.bf16 %v222_v30, %v220_v28 }
  0xdb   :  { %1815 = vmatpush1.bf16.msra.mxu1 %v1814_v43  ;;  %v375_v43 = vld [vmem:[#allocation8 + $0x1f0] sm:$0xff] }
  0xdc   :  { %1817 = vmatprep.subr.bf16.mxu1 %v1816_v44  ;;  %v2829_v44 = vpack.c.bf16 %v375_v43, %v373_v42 }
  0xde   :  { %1899 = vmatpush1.bf16.msra.mxu0 %v2829_v44 }
  0xdf   :  { %1819 = vmatpush1.bf16.msra.mxu1 %v1818_v53  ;;  %1965 = vmatprep.subr.bf16.mxu0 %v2735_v17 }
  0xe0   :  { %1821 = vmatprep.subr.bf16.mxu1 %v1820_v57  ;;  %v2899_v57 = vshrl.u32 %v87_v5, 7 }
  0xe1   :  { %442 = vmatmul.mubr.f32.vlgmr.msra.gmra.mrb[0].mxu0 %v2612_v45 }
  0xe2   :  { %1967 = vmatpush1.bf16.msra.mxu0 %v2737_v21  ;;  %v228_v59 = vsub.s32 0, %v2899_v57  ;;  %v232_v61 = vsub.s32 1, %v2899_v57 }
  0xe3   :  { %1823 = vmatpush1.bf16.msra.mxu1 %v1822_v3  ;;  %1969 = vmatprep.subr.bf16.mxu0 %v2739_v22 }
  0xe4   :  { %1825 = vmatprep.subr.bf16.mxu1 %v1824_v6  ;;  %v229_v1 = vrot.slane %v224_v60, %v228_v59  ;;  %v233_v3 = vrot.slane %v224_v60, %v232_v61 }
  0xe6   :  { %1971 = vmatpush1.bf16.msra.mxu0 %v2743_v29 }
  0xe7   :  { %1827 = vmatpush1.bf16.msra.mxu1 %v1826_v13  ;;  %1973 = vmatprep.subr.bf16.mxu0 %v2746_v31 }
  0xe8   :  { %1829 = vmatprep.subr.bf16.mxu1 %v1828_v14 }
  0xea   :  { %1975 = vmatpush1.bf16.msra.mxu0 %v2749_v38 }
  0xeb   :  { %1831 = vmatpush1.bf16.msra.mxu1 %v1830_v26  ;;  %1977 = vmatprep.subr.bf16.mxu0 %v2752_v40 }
  0xec   :  { %1833 = vmatprep.subr.bf16.mxu1 %v1832_v27  ;;  %v2613_v27 = vmov 1966171168  }
  0xed   :  { %v470_v28 = vunpack.c.l.s4 %v2613_v27 }
  0xee   :  { %1979 = vmatpush1.bf16.msra.mxu0 %v2755_v47 }
  0xef   :  { %1835 = vmatpush1.bf16.msra.mxu1 %v1834_v34  ;;  %1981 = vmatprep.subr.bf16.mxu0 %v2758_v49  ;;  %v471_v35 = vunpack.c.0.s8 %v470_v28 }
  0xf0   :  { %1901 = vmatprep.subr.bf16.mxu1 %v2735_v17 }
  0xf1   :  { %v2919_v42 = vsub.s32 %v471_v35, %v2899_v57 }
  0xf2   :  { %1983 = vmatpush1.bf16.msra.mxu0 %v2761_v56 }
  0xf3   :  { %1985 = vmatprep.subr.bf16.mxu0 %v2764_v58 }
  0xf6   :  { %1987 = vmatpush1.bf16.msra.mxu0 %v2767_v0 }
  0xf7   :  { %1989 = vmatprep.subr.bf16.mxu0 %v2770_v2 }
  0xfa   :  { %1991 = vmatpush1.bf16.msra.mxu0 %v2773_v8 }
  0xfb   :  { %1993 = vmatprep.subr.bf16.mxu0 %v2776_v10 }
  0xfe   :  { %1995 = vmatpush1.bf16.msra.mxu0 %v2779_v15 }
  0xff   :  { %1997 = vmatprep.subr.bf16.mxu0 %v2782_v16 }
 0x102   :  { %1999 = vmatpush1.bf16.msra.mxu0 %v2785_v24 }
 0x103   :  { %2001 = vmatprep.subr.bf16.mxu0 %v2788_v25 }
 0x106   :  { %2003 = vmatpush1.bf16.msra.mxu0 %v2791_v32 }
 0x107   :  { %2005 = vmatprep.subr.bf16.mxu0 %v2794_v33 }
 0x10a   :  { %2007 = vmatpush1.bf16.msra.mxu0 %v2797_v39 }
 0x10b   :  { %2009 = vmatprep.subr.bf16.mxu0 %v2800_v41 }
 0x10e   :  { %2011 = vmatpush1.bf16.msra.mxu0 %v2803_v46 }
 0x10f   :  { %2013 = vmatprep.subr.bf16.mxu0 %v2806_v48 }
 0x112   :  { %2015 = vmatpush1.bf16.msra.mxu0 %v2809_v54 }
 0x113   :  { %2017 = vmatprep.subr.bf16.mxu0 %v2812_v55 }
 0x116   :  { %2019 = vmatpush1.bf16.msra.mxu0 %v2815_v62 }
 0x117   :  { %2021 = vmatprep.subr.bf16.mxu0 %v2818_v63 }
 0x11a   :  { %2023 = vmatpush1.bf16.msra.mxu0 %v2821_v4 }
 0x11b   :  { %2025 = vmatprep.subr.bf16.mxu0 %v2827_v37 }
 0x11e   :  { %2027 = vmatpush1.bf16.msra.mxu0 %v2829_v44 }
 0x11f   :  { %2093 = vmatprep.subr.bf16.mxu0 %v2735_v17 }
 0x1a5   :  { %v1771_v50 = vpop.f32.mrb[0].mxu1 }
 0x1a6   :  { %v183_v51 = vpop.f32.mrb[1].mxu1 }
 0x1a7   :  { %301 = vmatmul.mubr.f32.vlgmr.msra.gmra.mrb[2].mxu1 %v183_v51 }
 0x1a8   :  { %306 = vmatprep.mubr.f32.mxu1 %v2612_v45  ;;  %1903 = vmatpush1.bf16.msra.mxu1 %v2737_v21 }
 0x1a9   :  { %1905 = vmatprep.subr.bf16.mxu1 %v2739_v22 }
 0x1ab   :  { %307 = vmatmul.mubr.f32.gmra.mrb[4].mxu1 %v1771_v50 }
 0x1ac   :  { %1907 = vmatpush1.bf16.msra.mxu1 %v2743_v29 }
 0x1ad   :  { %1909 = vmatprep.subr.bf16.mxu1 %v2746_v31 }
 0x1b0   :  { %1911 = vmatpush1.bf16.msra.mxu1 %v2749_v38 }
 0x1b1   :  { %1913 = vmatprep.subr.bf16.mxu1 %v2752_v40 }
 0x1b4   :  { %1915 = vmatpush1.bf16.msra.mxu1 %v2755_v47  ;;  %v443_v52 = vpop.f32.mrb[0].mxu0 }
 0x1b5   :  { %1917 = vmatprep.subr.bf16.mxu1 %v2758_v49  ;;  %v445_v53 = vpop.f32.mrb[1].mxu0  ;;  %v450_v12 = vrot.slane %v443_v52, 1 }
 0x1b6   :  { %v451_v14 = vrot.slane %v445_v53, 1 }
 0x1b8   :  { %1919 = vmatpush1.bf16.msra.mxu1 %v2761_v56 }
 0x1b9   :  { %1921 = vmatprep.subr.bf16.mxu1 %v2764_v58 }
 0x1bc   :  { %1923 = vmatpush1.bf16.msra.mxu1 %v2767_v0 }
 0x1bd   :  { %1925 = vmatprep.subr.bf16.mxu1 %v2770_v2 }
 0x1c0   :  { %1927 = vmatpush1.bf16.msra.mxu1 %v2773_v8 }
 0x1c1   :  { %1929 = vmatprep.subr.bf16.mxu1 %v2776_v10 }
 0x1c4   :  { %1931 = vmatpush1.bf16.msra.mxu1 %v2779_v15 }
 0x1c5   :  { %1933 = vmatprep.subr.bf16.mxu1 %v2782_v16 }
 0x1c8   :  { %1935 = vmatpush1.bf16.msra.mxu1 %v2785_v24 }
 0x1c9   :  { %1937 = vmatprep.subr.bf16.mxu1 %v2788_v25 }
 0x1cc   :  { %1939 = vmatpush1.bf16.msra.mxu1 %v2791_v32 }
 0x1cd   :  { %1941 = vmatprep.subr.bf16.mxu1 %v2794_v33 }
 0x1d0   :  { %1943 = vmatpush1.bf16.msra.mxu1 %v2797_v39 }
 0x1d1   :  { %1945 = vmatprep.subr.bf16.mxu1 %v2800_v41 }
 0x1d4   :  { %1947 = vmatpush1.bf16.msra.mxu1 %v2803_v46 }
 0x1d5   :  { %1949 = vmatprep.subr.bf16.mxu1 %v2806_v48 }
 0x1d8   :  { %1951 = vmatpush1.bf16.msra.mxu1 %v2809_v54 }
 0x1d9   :  { %1953 = vmatprep.subr.bf16.mxu1 %v2812_v55 }
 0x1dc   :  { %1955 = vmatpush1.bf16.msra.mxu1 %v2815_v62 }
 0x1dd   :  { %1957 = vmatprep.subr.bf16.mxu1 %v2818_v63 }
 0x1e0   :  { %1959 = vmatpush1.bf16.msra.mxu1 %v2821_v4 }
 0x1e1   :  { %1961 = vmatprep.subr.bf16.mxu1 %v2827_v37 }
 0x1e4   :  { %1963 = vmatpush1.bf16.msra.mxu1 %v2829_v44 }
 0x1e5   :  { %2029 = vmatprep.subr.bf16.mxu1 %v2735_v17 }
 0x27a   :  { %v302_v6 = vpop.f32.mrb[2].mxu1 }
 0x27b   :  { %v2906_v7 = vadd.f32 %v302_v6, %v229_v1  ;;  %v304_v9 = vpop.f32.mrb[3].mxu1 }
 0x27c   :  { %v2908_v11 = vadd.f32 %v304_v9, %v233_v3 }
 0x27d   :  { %v456_v13 = vadd.f32 %v443_v52, %v2906_v7 }
 0x27e   :  { %v457_v18 = vadd.f32 %v445_v53, %v2908_v11  ;;  %v308_v19 = vpop.f32.mrb[4].mxu1 }
 0x27f   :  { %2396 = vtanh.f32 %v456_v13  ;;  %v2912_v20 = vadd.f32 %v308_v19, %v229_v1  ;;  %v310_v23 = vpop.f32.mrb[5].mxu1 }
 0x280   :  { %2398 = vtanh.f32 %v457_v18  ;;  %v2914_v26 = vadd.f32 %v310_v23, %v233_v3 }
 0x281   :  { %v458_v30 = vadd.f32 %v450_v12, %v2912_v20 }
 0x282   :  { %v459_v34 = vadd.f32 %v451_v14, %v2914_v26 }
 0x283   :  { %2400 = vtanh.f32 %v458_v30 }
 0x284   :  { %2402 = vtanh.f32 %v459_v34 }
 0x289   :  { %v2397_v36 = vpop.eup %2396 }
 0x28a   :  { %v2399_v43 = vpop.eup %2398 }
 0x28b   :  { %v468_v45 = vcombine.low %v2397_v36, %v2399_v43 }
 0x28d   :  { %v2401_v50 = vpop.eup %2400  ;;  %v475_v51 = vrot.slane %v468_v45, %v2919_v42 }
 0x28e   :  { %v2403_v52 = vpop.eup %2402  ;;  %v509_v59 = vrot.slane %v2401_v50, 7 }
 0x28f   :  { %v482_v60 = vrot.slane %v475_v51, %v2919_v42  ;;  %v512_v61 = vrot.slane %v2403_v52, 7  ;;  %v483_v1 = vcombine.low %v2401_v50, %v2403_v52 }
 0x290   :  { %v511_v9 = vsel %vm510_vm3, %v509_v59, %v2397_v36 }
 0x291   :  { %504 = vst.msk [vmem:[#allocation2] ss:$8 sm:$0x3] %vm2923_vm2, %v482_v60  ;;  %v513_v3 = vsel %vm510_vm3, %v512_v61, %v2399_v43  ;;  %v490_v6 = vrot.slane %v483_v1, %v2919_v42 }
 0x292   :  { %580 = vmatprep.mubr.f32.mxu1 %v513_v3 }
 0x293   :  { %v497_v5 = vrot.slane %v490_v6, %v2919_v42  ;;  %581 = vmatmul.mubr.f32.vlgmr.msra.gmra.mrb[6].mxu1 %v511_v9 }
 0x294   :  { %2031 = vmatpush1.bf16.msra.mxu1 %v2737_v21 }
 0x295   :  { %507 = vst.msk [vmem:[#allocation2 + $0x10] ss:$8 sm:$0x3] %vm2923_vm2, %v497_v5  ;;  %2033 = vmatprep.subr.bf16.mxu1 %v2739_v22 }
 0x298   :  { %2035 = vmatpush1.bf16.msra.mxu1 %v2743_v29 }
 0x299   :  { %2037 = vmatprep.subr.bf16.mxu1 %v2746_v31 }
 0x29c   :  { %2039 = vmatpush1.bf16.msra.mxu1 %v2749_v38 }
 0x29d   :  { %2041 = vmatprep.subr.bf16.mxu1 %v2752_v40 }
 0x2a0   :  { %2043 = vmatpush1.bf16.msra.mxu1 %v2755_v47 }
 0x2a1   :  { %2045 = vmatprep.subr.bf16.mxu1 %v2758_v49 }
 0x2a4   :  { %2047 = vmatpush1.bf16.msra.mxu1 %v2761_v56 }
 0x2a5   :  { %2049 = vmatprep.subr.bf16.mxu1 %v2764_v58 }
 0x2a8   :  { %2051 = vmatpush1.bf16.msra.mxu1 %v2767_v0 }
 0x2a9   :  { %2053 = vmatprep.subr.bf16.mxu1 %v2770_v2 }
 0x2ac   :  { %2055 = vmatpush1.bf16.msra.mxu1 %v2773_v8 }
 0x2ad   :  { %2057 = vmatprep.subr.bf16.mxu1 %v2776_v10 }
 0x2b0   :  { %2059 = vmatpush1.bf16.msra.mxu1 %v2779_v15 }
 0x2b1   :  { %2061 = vmatprep.subr.bf16.mxu1 %v2782_v16 }
 0x2b4   :  { %2063 = vmatpush1.bf16.msra.mxu1 %v2785_v24 }
 0x2b5   :  { %2065 = vmatprep.subr.bf16.mxu1 %v2788_v25 }
 0x2b8   :  { %2067 = vmatpush1.bf16.msra.mxu1 %v2791_v32 }
 0x2b9   :  { %2069 = vmatprep.subr.bf16.mxu1 %v2794_v33 }
 0x2bc   :  { %2071 = vmatpush1.bf16.msra.mxu1 %v2797_v39 }
 0x2bd   :  { %2073 = vmatprep.subr.bf16.mxu1 %v2800_v41 }
 0x2c0   :  { %2075 = vmatpush1.bf16.msra.mxu1 %v2803_v46 }
 0x2c1   :  { %2077 = vmatprep.subr.bf16.mxu1 %v2806_v48 }
 0x2c4   :  { %2079 = vmatpush1.bf16.msra.mxu1 %v2809_v54 }
 0x2c5   :  { %2081 = vmatprep.subr.bf16.mxu1 %v2812_v55 }
 0x2c8   :  { %2083 = vmatpush1.bf16.msra.mxu1 %v2815_v62 }
 0x2c9   :  { %2085 = vmatprep.subr.bf16.mxu1 %v2818_v63 }
 0x2cc   :  { %2087 = vmatpush1.bf16.msra.mxu1 %v2821_v4 }
 0x2cd   :  { %2089 = vmatprep.subr.bf16.mxu1 %v2827_v37 }
 0x2d0   :  { %2091 = vmatpush1.bf16.msra.mxu1 %v2829_v44 }
 0x2d1   :  { %2157 = vmatprep.subr.bf16.mxu1 %v2735_v17 }
 0x366   :  { %v582_v12 = vpop.f32.mrb[6].mxu1 }
 0x367   :  { %v589_v13 = vrot.slane %v582_v12, 7  ;;  %v597_v14 = vadd.f32 %v582_v12, %v2912_v20  ;;  %v584_v18 = vpop.f32.mrb[7].mxu1 }
 0x368   :  { %v590_v19 = vrot.slane %v584_v18, 7  ;;  %v598_v23 = vadd.f32 %v584_v18, %v2914_v26 }
 0x369   :  { %v595_v27 = vadd.f32 %v589_v13, %v2906_v7  ;;  %2404 = vtanh.f32 %v597_v14 }
 0x36a   :  { %v596_v28 = vadd.f32 %v590_v19, %v2908_v11  ;;  %2406 = vtanh.f32 %v598_v23 }
 0x36b   :  { %2408 = vtanh.f32 %v595_v27 }
 0x36c   :  { %2410 = vtanh.f32 %v596_v28 }
 0x373   :  { %v2405_v30 = vpop.eup %2404 }
 0x374   :  { %v2407_v34 = vpop.eup %2406 }
 0x375   :  { %v2409_v35 = vpop.eup %2408  ;;  %v623_v36 = vcombine.low %v2405_v30, %v2407_v34 }
 0x376   :  { %v2411_v43 = vpop.eup %2410  ;;  %v647_v45 = vrot.slane %v2409_v35, 1 }
 0x377   :  { %v607_v50 = vcombine.low %v2409_v35, %v2411_v43  ;;  %v630_v51 = vrot.slane %v623_v36, %v2919_v42  ;;  %v649_v52 = vrot.slane %v2411_v43, 1 }
 0x378   :  { %v648_v1 = vsel %vm510_vm3, %v2405_v30, %v647_v45 }
 0x379   :  { %v614_v59 = vrot.slane %v607_v50, %v2919_v42  ;;  %v631_v60 = vcombine.high %v630_v51, %v630_v51  ;;  %v650_v61 = vsel %vm510_vm3, %v2407_v34, %v649_v52 }
 0x37a   :  { %717 = vmatprep.mubr.f32.mxu0 %v650_v61 }
 0x37b   :  { %v615_v3 = vcombine.high %v614_v59, %v614_v59  ;;  %v638_v6 = vrot.slane %v631_v60, %v2919_v42  ;;  %718 = vmatmul.mubr.f32.vlgmr.msra.gmra.mrb[2].mxu0 %v648_v1 }
 0x37c   :  { %2095 = vmatpush1.bf16.msra.mxu0 %v2737_v21 }
 0x37d   :  { %v622_v9 = vrot.slane %v615_v3, %v2919_v42  ;;  %645 = vst.msk [vmem:[#allocation2 + $0x11] ss:$8 sm:$0x3] %vm2923_vm2, %v638_v6  ;;  %2097 = vmatprep.subr.bf16.mxu0 %v2739_v22 }
 0x37f   :  { %642 = vst.msk [vmem:[#allocation2 + $0x1] ss:$8 sm:$0x3] %vm2923_vm2, %v622_v9 }
 0x380   :  { %2099 = vmatpush1.bf16.msra.mxu0 %v2743_v29 }
 0x381   :  { %2101 = vmatprep.subr.bf16.mxu0 %v2746_v31 }
 0x384   :  { %2103 = vmatpush1.bf16.msra.mxu0 %v2749_v38 }
 0x385   :  { %2105 = vmatprep.subr.bf16.mxu0 %v2752_v40 }
 0x388   :  { %2107 = vmatpush1.bf16.msra.mxu0 %v2755_v47 }
 0x389   :  { %2109 = vmatprep.subr.bf16.mxu0 %v2758_v49 }
 0x38c   :  { %2111 = vmatpush1.bf16.msra.mxu0 %v2761_v56 }
 0x38d   :  { %2113 = vmatprep.subr.bf16.mxu0 %v2764_v58 }
 0x390   :  { %2115 = vmatpush1.bf16.msra.mxu0 %v2767_v0 }
 0x391   :  { %2117 = vmatprep.subr.bf16.mxu0 %v2770_v2 }
 0x394   :  { %2119 = vmatpush1.bf16.msra.mxu0 %v2773_v8 }
 0x395   :  { %2121 = vmatprep.subr.bf16.mxu0 %v2776_v10 }
 0x398   :  { %2123 = vmatpush1.bf16.msra.mxu0 %v2779_v15 }
 0x399   :  { %2125 = vmatprep.subr.bf16.mxu0 %v2782_v16 }
 0x39c   :  { %2127 = vmatpush1.bf16.msra.mxu0 %v2785_v24 }
 0x39d   :  { %2129 = vmatprep.subr.bf16.mxu0 %v2788_v25 }
 0x3a0   :  { %2131 = vmatpush1.bf16.msra.mxu0 %v2791_v32 }
 0x3a1   :  { %2133 = vmatprep.subr.bf16.mxu0 %v2794_v33 }
 0x3a4   :  { %2135 = vmatpush1.bf16.msra.mxu0 %v2797_v39 }
 0x3a5   :  { %2137 = vmatprep.subr.bf16.mxu0 %v2800_v41 }
 0x3a8   :  { %2139 = vmatpush1.bf16.msra.mxu0 %v2803_v46 }
 0x3a9   :  { %2141 = vmatprep.subr.bf16.mxu0 %v2806_v48 }
 0x3ac   :  { %2143 = vmatpush1.bf16.msra.mxu0 %v2809_v54 }
 0x3ad   :  { %2145 = vmatprep.subr.bf16.mxu0 %v2812_v55 }
 0x3b0   :  { %2147 = vmatpush1.bf16.msra.mxu0 %v2815_v62 }
 0x3b1   :  { %2149 = vmatprep.subr.bf16.mxu0 %v2818_v63 }
 0x3b4   :  { %2151 = vmatpush1.bf16.msra.mxu0 %v2821_v4 }
 0x3b5   :  { %2153 = vmatprep.subr.bf16.mxu0 %v2827_v37 }
 0x3b8   :  { %2155 = vmatpush1.bf16.msra.mxu0 %v2829_v44 }
 0x3b9   :  { %2221 = vmatprep.subr.bf16.mxu0 %v2735_v17 }
 0x44e   :  { %v719_v5 = vpop.f32.mrb[2].mxu0 }
 0x44f   :  { %v726_v12 = vrot.slane %v719_v5, 6  ;;  %v728_v13 = vrot.slane %v719_v5, 7  ;;  %v721_v14 = vpop.f32.mrb[3].mxu0 }
 0x450   :  { %v727_v18 = vrot.slane %v721_v14, 6  ;;  %v729_v19 = vrot.slane %v721_v14, 7 }
 0x451   :  { %v734_v23 = vadd.f32 %v726_v12, %v2906_v7  ;;  %v736_v27 = vadd.f32 %v728_v13, %v2912_v20 }
 0x452   :  { %v735_v28 = vadd.f32 %v727_v18, %v2908_v11  ;;  %v737_v30 = vadd.f32 %v729_v19, %v2914_v26 }
 0x453   :  { %2412 = vtanh.f32 %v734_v23 }
 0x454   :  { %2414 = vtanh.f32 %v736_v27 }
 0x455   :  { %2416 = vtanh.f32 %v735_v28 }
 0x456   :  { %2418 = vtanh.f32 %v737_v30 }
 0x45d   :  { %v2413_v34 = vpop.eup %2412 }
 0x45e   :  { %v2415_v35 = vpop.eup %2414  ;;  %v786_v51 = vrot.slane %v2413_v34, 2 }
 0x45f   :  { %v2417_v36 = vpop.eup %2416  ;;  %v787_v52 = vrot.slane %v2415_v35, 1 }
 0x460   :  { %v2419_v43 = vpop.eup %2418  ;;  %v746_v45 = vcombine.low %v2413_v34, %v2417_v36  ;;  %v789_v50 = vrot.slane %v2417_v36, 2 }
 0x461   :  { %v762_v59 = vcombine.low %v2415_v35, %v2419_v43  ;;  %v790_v60 = vrot.slane %v2419_v43, 1  ;;  %v788_v9 = vsel %vm510_vm3, %v787_v52, %v786_v51 }
 0x462   :  { %v753_v61 = vrot.slane %v746_v45, %v2919_v42 }
 0x463   :  { %v769_v1 = vrot.slane %v762_v59, %v2919_v42  ;;  %v791_v3 = vsel %vm510_vm3, %v790_v60, %v789_v50 }
 0x464   :  { %v760_v6 = vrot.slane %v753_v61, %v2919_v42  ;;  %858 = vmatprep.mubr.f32.mxu1 %v791_v3 }
 0x465   :  { %v776_v5 = vrot.slane %v769_v1, %v2919_v42  ;;  %859 = vmatmul.mubr.f32.vlgmr.msra.gmra.mrb[8].mxu1 %v788_v9 }
 0x466   :  { %v761_v12 = vcombine.high %v760_v6, %v760_v6  ;;  %2159 = vmatpush1.bf16.msra.mxu1 %v2737_v21 }
 0x467   :  { %v777_v13 = vcombine.high %v776_v5, %v776_v5  ;;  %2161 = vmatprep.subr.bf16.mxu1 %v2739_v22 }
 0x468   :  { %781 = vst.msk [vmem:[#allocation2 + $0x2] ss:$8 sm:$0x3] %vm2923_vm2, %v761_v12 }
 0x469   :  { %784 = vst.msk [vmem:[#allocation2 + $0x12] ss:$8 sm:$0x3] %vm2923_vm2, %v777_v13 }
 0x46a   :  { %2163 = vmatpush1.bf16.msra.mxu1 %v2743_v29 }
 0x46b   :  { %2165 = vmatprep.subr.bf16.mxu1 %v2746_v31 }
 0x46e   :  { %2167 = vmatpush1.bf16.msra.mxu1 %v2749_v38 }
 0x46f   :  { %2169 = vmatprep.subr.bf16.mxu1 %v2752_v40 }
 0x472   :  { %2171 = vmatpush1.bf16.msra.mxu1 %v2755_v47 }
 0x473   :  { %2173 = vmatprep.subr.bf16.mxu1 %v2758_v49 }
 0x476   :  { %2175 = vmatpush1.bf16.msra.mxu1 %v2761_v56 }
 0x477   :  { %2177 = vmatprep.subr.bf16.mxu1 %v2764_v58 }
 0x47a   :  { %2179 = vmatpush1.bf16.msra.mxu1 %v2767_v0 }
 0x47b   :  { %2181 = vmatprep.subr.bf16.mxu1 %v2770_v2 }
 0x47e   :  { %2183 = vmatpush1.bf16.msra.mxu1 %v2773_v8 }
 0x47f   :  { %2185 = vmatprep.subr.bf16.mxu1 %v2776_v10 }
 0x482   :  { %2187 = vmatpush1.bf16.msra.mxu1 %v2779_v15 }
 0x483   :  { %2189 = vmatprep.subr.bf16.mxu1 %v2782_v16 }
 0x486   :  { %2191 = vmatpush1.bf16.msra.mxu1 %v2785_v24 }
 0x487   :  { %2193 = vmatprep.subr.bf16.mxu1 %v2788_v25 }
 0x48a   :  { %2195 = vmatpush1.bf16.msra.mxu1 %v2791_v32 }
 0x48b   :  { %2197 = vmatprep.subr.bf16.mxu1 %v2794_v33 }
 0x48e   :  { %2199 = vmatpush1.bf16.msra.mxu1 %v2797_v39 }
 0x48f   :  { %2201 = vmatprep.subr.bf16.mxu1 %v2800_v41 }
 0x492   :  { %2203 = vmatpush1.bf16.msra.mxu1 %v2803_v46 }
 0x493   :  { %2205 = vmatprep.subr.bf16.mxu1 %v2806_v48 }
 0x496   :  { %2207 = vmatpush1.bf16.msra.mxu1 %v2809_v54 }
 0x497   :  { %2209 = vmatprep.subr.bf16.mxu1 %v2812_v55 }
 0x49a   :  { %2211 = vmatpush1.bf16.msra.mxu1 %v2815_v62 }
 0x49b   :  { %2213 = vmatprep.subr.bf16.mxu1 %v2818_v63 }
 0x49e   :  { %2215 = vmatpush1.bf16.msra.mxu1 %v2821_v4 }
 0x49f   :  { %2217 = vmatprep.subr.bf16.mxu1 %v2827_v37 }
 0x4a2   :  { %2219 = vmatpush1.bf16.msra.mxu1 %v2829_v44 }
 0x4a3   :  { %2285 = vmatprep.subr.bf16.mxu1 %v2735_v17 }
 0x538   :  { %v860_v14 = vpop.f32.mrb[8].mxu1 }
 0x539   :  { %v867_v18 = vrot.slane %v860_v14, 5  ;;  %v869_v19 = vrot.slane %v860_v14, 6  ;;  %v862_v23 = vpop.f32.mrb[9].mxu1 }
 0x53a   :  { %v868_v27 = vrot.slane %v862_v23, 5  ;;  %v870_v28 = vrot.slane %v862_v23, 6 }
 0x53b   :  { %v875_v30 = vadd.f32 %v867_v18, %v2906_v7  ;;  %v877_v34 = vadd.f32 %v869_v19, %v2912_v20 }
 0x53c   :  { %v876_v35 = vadd.f32 %v868_v27, %v2908_v11  ;;  %v878_v36 = vadd.f32 %v870_v28, %v2914_v26 }
 0x53d   :  { %2420 = vtanh.f32 %v875_v30 }
 0x53e   :  { %2422 = vtanh.f32 %v877_v34 }
 0x53f   :  { %2424 = vtanh.f32 %v876_v35 }
 0x540   :  { %2426 = vtanh.f32 %v878_v36 }
 0x547   :  { %v2421_v43 = vpop.eup %2420 }
 0x548   :  { %v2423_v17 = vpop.eup %2422  ;;  %v929_v59 = vrot.slane %v2421_v43, 3 }
 0x549   :  { %v2425_v45 = vpop.eup %2424  ;;  %v930_v60 = vrot.slane %v2423_v17, 2 }
 0x54a   :  { %v2427_v50 = vpop.eup %2426  ;;  %v887_v51 = vcombine.low %v2421_v43, %v2425_v45  ;;  %v932_v52 = vrot.slane %v2425_v45, 3 }
 0x54b   :  { %v904_v61 = vcombine.low %v2423_v17, %v2427_v50  ;;  %v933_v1 = vrot.slane %v2427_v50, 2  ;;  %v931_v12 = vsel %vm510_vm3, %v930_v60, %v929_v59 }
 0x54c   :  { %v894_v3 = vrot.slane %v887_v51, %v2919_v42 }
 0x54d   :  { %v911_v6 = vrot.slane %v904_v61, %v2919_v42  ;;  %v934_v9 = vsel %vm510_vm3, %v933_v1, %v932_v52 }
 0x54e   :  { %v895_v5 = vcombine.high %v894_v3, %v894_v3  ;;  %1001 = vmatprep.mubr.f32.mxu0 %v934_v9 }
 0x54f   :  { %v912_v13 = vcombine.high %v911_v6, %v911_v6  ;;  %1002 = vmatmul.mubr.f32.vlgmr.msra.gmra.mrb[4].mxu0 %v931_v12 }
 0x550   :  { %v902_v14 = vrot.slane %v895_v5, %v2919_v42  ;;  %2223 = vmatpush1.bf16.msra.mxu0 %v2737_v21 }
 0x551   :  { %v919_v18 = vrot.slane %v912_v13, %v2919_v42  ;;  %2225 = vmatprep.subr.bf16.mxu0 %v2739_v22 }
 0x552   :  { %v903_v19 = vcombine.high %v902_v14, %v902_v14 }
 0x553   :  { %v920_v23 = vcombine.high %v919_v18, %v919_v18 }
 0x554   :  { %924 = vst.msk [vmem:[#allocation2 + $0x3] ss:$8 sm:$0x3] %vm2923_vm2, %v903_v19  ;;  %2227 = vmatpush1.bf16.msra.mxu0 %v2743_v29 }
 0x555   :  { %927 = vst.msk [vmem:[#allocation2 + $0x13] ss:$8 sm:$0x3] %vm2923_vm2, %v920_v23  ;;  %2229 = vmatprep.subr.bf16.mxu0 %v2746_v31 }
 0x558   :  { %2231 = vmatpush1.bf16.msra.mxu0 %v2749_v38 }
 0x559   :  { %2233 = vmatprep.subr.bf16.mxu0 %v2752_v40 }
 0x55c   :  { %2235 = vmatpush1.bf16.msra.mxu0 %v2755_v47 }
 0x55d   :  { %2237 = vmatprep.subr.bf16.mxu0 %v2758_v49 }
 0x560   :  { %2239 = vmatpush1.bf16.msra.mxu0 %v2761_v56 }
 0x561   :  { %2241 = vmatprep.subr.bf16.mxu0 %v2764_v58 }
 0x564   :  { %2243 = vmatpush1.bf16.msra.mxu0 %v2767_v0 }
 0x565   :  { %2245 = vmatprep.subr.bf16.mxu0 %v2770_v2 }
 0x568   :  { %2247 = vmatpush1.bf16.msra.mxu0 %v2773_v8 }
 0x569   :  { %2249 = vmatprep.subr.bf16.mxu0 %v2776_v10 }
 0x56c   :  { %2251 = vmatpush1.bf16.msra.mxu0 %v2779_v15 }
 0x56d   :  { %2253 = vmatprep.subr.bf16.mxu0 %v2782_v16 }
 0x570   :  { %2255 = vmatpush1.bf16.msra.mxu0 %v2785_v24 }
 0x571   :  { %2257 = vmatprep.subr.bf16.mxu0 %v2788_v25 }
 0x574   :  { %2259 = vmatpush1.bf16.msra.mxu0 %v2791_v32 }
 0x575   :  { %2261 = vmatprep.subr.bf16.mxu0 %v2794_v33 }
 0x578   :  { %2263 = vmatpush1.bf16.msra.mxu0 %v2797_v39 }
 0x579   :  { %2265 = vmatprep.subr.bf16.mxu0 %v2800_v41 }
 0x57c   :  { %2267 = vmatpush1.bf16.msra.mxu0 %v2803_v46 }
 0x57d   :  { %2269 = vmatprep.subr.bf16.mxu0 %v2806_v48 }
 0x580   :  { %2271 = vmatpush1.bf16.msra.mxu0 %v2809_v54 }
 0x581   :  { %2273 = vmatprep.subr.bf16.mxu0 %v2812_v55 }
 0x584   :  { %2275 = vmatpush1.bf16.msra.mxu0 %v2815_v62 }
 0x585   :  { %2277 = vmatprep.subr.bf16.mxu0 %v2818_v63 }
 0x588   :  { %2279 = vmatpush1.bf16.msra.mxu0 %v2821_v4 }
 0x589   :  { %2281 = vmatprep.subr.bf16.mxu0 %v2827_v37 }
 0x58c   :  { %2283 = vmatpush1.bf16.msra.mxu0 %v2829_v44 }
 0x622   :  { %v1003_v27 = vpop.f32.mrb[4].mxu0 }
 0x623   :  { %v1010_v28 = vrot.slane %v1003_v27, 4  ;;  %v1012_v30 = vrot.slane %v1003_v27, 5  ;;  %v1005_v34 = vpop.f32.mrb[5].mxu0 }
 0x624   :  { %v1011_v35 = vrot.slane %v1005_v34, 4  ;;  %v1013_v36 = vrot.slane %v1005_v34, 5 }
 0x625   :  { %v1018_v43 = vadd.f32 %v1010_v28, %v2906_v7  ;;  %v1020_v17 = vadd.f32 %v1012_v30, %v2912_v20 }
 0x626   :  { %v1019_v45 = vadd.f32 %v1011_v35, %v2908_v11  ;;  %v1021_v50 = vadd.f32 %v1013_v36, %v2914_v26 }
 0x627   :  { %2428 = vtanh.f32 %v1018_v43 }
 0x628   :  { %2430 = vtanh.f32 %v1020_v17 }
 0x629   :  { %2432 = vtanh.f32 %v1019_v45 }
 0x62a   :  { %2434 = vtanh.f32 %v1021_v50 }
 0x631   :  { %v2429_v51 = vpop.eup %2428 }
 0x632   :  { %v2431_v52 = vpop.eup %2430  ;;  %v1068_v3 = vrot.slane %v2429_v51, 4 }
 0x633   :  { %v2433_v59 = vpop.eup %2432  ;;  %v1069_v6 = vrot.slane %v2431_v52, 3 }
 0x634   :  { %v2435_v60 = vpop.eup %2434  ;;  %v1030_v61 = vcombine.high %v2429_v51, %v2433_v59  ;;  %v1071_v1 = vrot.slane %v2433_v59, 4 }
 0x635   :  { %v1045_v9 = vcombine.high %v2431_v52, %v2435_v60  ;;  %v1072_v5 = vrot.slane %v2435_v60, 3  ;;  %v1070_v19 = vsel %vm510_vm3, %v1069_v6, %v1068_v3 }
 0x636   :  { %v1037_v12 = vrot.slane %v1030_v61, %v2919_v42 }
 0x637   :  { %v1052_v13 = vrot.slane %v1045_v9, %v2919_v42  ;;  %v1073_v14 = vsel %vm510_vm3, %v1072_v5, %v1071_v1 }
 0x638   :  { %v1044_v18 = vrot.slane %v1037_v12, %v2919_v42  ;;  %1140 = vmatprep.mubr.f32.mxu1 %v1073_v14 }
 0x639   :  { %v1059_v23 = vrot.slane %v1052_v13, %v2919_v42  ;;  %1141 = vmatmul.mubr.f32.vlgmr.msra.gmra.mrb[10].mxu1 %v1070_v19 }
 0x63a   :  { %1063 = vst.msk [vmem:[#allocation2 + $0x4] ss:$8 sm:$0x3] %vm2923_vm2, %v1044_v18  ;;  %2287 = vmatpush1.bf16.msra.mxu1 %v2737_v21 }
 0x63b   :  { %1066 = vst.msk [vmem:[#allocation2 + $0x14] ss:$8 sm:$0x3] %vm2923_vm2, %v1059_v23  ;;  %2289 = vmatprep.subr.bf16.mxu1 %v2739_v22  ;;  %v1543_v23 = vld [vmem:[#allocation9 + $0x80] sm:$0xff] }
 0x63e   :  { %2291 = vmatpush1.bf16.msra.mxu1 %v2743_v29 }
 0x63f   :  { %2293 = vmatprep.subr.bf16.mxu1 %v2746_v31 }
 0x642   :  { %2295 = vmatpush1.bf16.msra.mxu1 %v2749_v38 }
 0x643   :  { %2297 = vmatprep.subr.bf16.mxu1 %v2752_v40 }
 0x646   :  { %2299 = vmatpush1.bf16.msra.mxu1 %v2755_v47 }
 0x647   :  { %2301 = vmatprep.subr.bf16.mxu1 %v2758_v49 }
 0x64a   :  { %2303 = vmatpush1.bf16.msra.mxu1 %v2761_v56 }
 0x64b   :  { %2305 = vmatprep.subr.bf16.mxu1 %v2764_v58 }
 0x64e   :  { %2307 = vmatpush1.bf16.msra.mxu1 %v2767_v0 }
 0x64f   :  { %2309 = vmatprep.subr.bf16.mxu1 %v2770_v2 }
 0x652   :  { %2311 = vmatpush1.bf16.msra.mxu1 %v2773_v8 }
 0x653   :  { %2313 = vmatprep.subr.bf16.mxu1 %v2776_v10 }
 0x656   :  { %2315 = vmatpush1.bf16.msra.mxu1 %v2779_v15 }
 0x657   :  { %2317 = vmatprep.subr.bf16.mxu1 %v2782_v16 }
 0x65a   :  { %2319 = vmatpush1.bf16.msra.mxu1 %v2785_v24 }
 0x65b   :  { %2321 = vmatprep.subr.bf16.mxu1 %v2788_v25 }
 0x65e   :  { %2323 = vmatpush1.bf16.msra.mxu1 %v2791_v32 }
 0x65f   :  { %2325 = vmatprep.subr.bf16.mxu1 %v2794_v33 }
 0x662   :  { %2327 = vmatpush1.bf16.msra.mxu1 %v2797_v39 }
 0x663   :  { %2329 = vmatprep.subr.bf16.mxu1 %v2800_v41 }
 0x666   :  { %2331 = vmatpush1.bf16.msra.mxu1 %v2803_v46 }
 0x667   :  { %2333 = vmatprep.subr.bf16.mxu1 %v2806_v48 }
 0x66a   :  { %2335 = vmatpush1.bf16.msra.mxu1 %v2809_v54 }
 0x66b   :  { %2337 = vmatprep.subr.bf16.mxu1 %v2812_v55 }
 0x66e   :  { %2339 = vmatpush1.bf16.msra.mxu1 %v2815_v62 }
 0x66f   :  { %2341 = vmatprep.subr.bf16.mxu1 %v2818_v63 }
 0x672   :  { %2343 = vmatpush1.bf16.msra.mxu1 %v2821_v4 }
 0x673   :  { %2345 = vmatprep.subr.bf16.mxu1 %v2827_v37 }
 0x676   :  { %2347 = vmatpush1.bf16.msra.mxu1 %v2829_v44 }
 0x70c   :  { %v1142_v21 = vpop.f32.mrb[10].mxu1 }
 0x70d   :  { %v1149_v22 = vrot.slane %v1142_v21, 3  ;;  %v1151_v29 = vrot.slane %v1142_v21, 4  ;;  %v1144_v31 = vpop.f32.mrb[11].mxu1  ;;  %v1544_v21 = vld [vmem:[#allocation9 + $0x88] sm:$0xff] }
 0x70e   :  { %v1150_v38 = vrot.slane %v1144_v31, 3  ;;  %v1152_v40 = vrot.slane %v1144_v31, 4  ;;  %v1528_v31 = vld [vmem:[#allocation9 + $0x8] sm:$0xff] }
 0x70f   :  { %v1157_v47 = vadd.f32 %v1149_v22, %v2906_v7  ;;  %v1159_v49 = vadd.f32 %v1151_v29, %v2912_v20  ;;  %v2348_v22 = vpack.c.bf16 %v1544_v21, %v1543_v23  ;;  %v1527_v29 = vld [vmem:[#allocation9] sm:$0xff]  ;;  %v2614_v21 = vmov 1983009808  }
 0x710   :  { %v1158_v56 = vadd.f32 %v1150_v38, %v2908_v11  ;;  %v1160_v58 = vadd.f32 %v1152_v40, %v2914_v26  ;;  %v2350_v38 = vpack.c.bf16 %v1528_v31, %v1527_v29  ;;  %v1545_v40 = vld [vmem:[#allocation9 + $0x90] sm:$0xff] }
 0x711   :  { %2436 = vtanh.f32 %v1157_v47  ;;  %2349 = vmatprep.subr.bf16.mxu0 %v2348_v22  ;;  %v1546_v47 = vld [vmem:[#allocation9 + $0x98] sm:$0xff]  ;;  %v1494_v22 = vunpack.c.l.s4 %v2614_v21 }
 0x712   :  { %2438 = vtanh.f32 %v1159_v49  ;;  %v2352_v49 = vpack.c.bf16 %v1546_v47, %v1545_v40 }
 0x713   :  { %2440 = vtanh.f32 %v1158_v56  ;;  %v1529_v56 = vld [vmem:[#allocation9 + $0x10] sm:$0xff]  ;;  %v1495_v29 = vunpack.c.0.s8 %v1494_v22 }
 0x714   :  { %2442 = vtanh.f32 %v1160_v58  ;;  %v1530_v58 = vld [vmem:[#allocation9 + $0x18] sm:$0xff] }
 0x715   :  { %v1498_v40 = vsub.s32 %v1495_v29, %v2899_v57 }
 0x71b   :  { %v2437_v0 = vpop.eup %2436 }
 0x71c   :  { %v2439_v2 = vpop.eup %2438  ;;  %v1209_v24 = vrot.slane %v2437_v0, 5 }
 0x71d   :  { %v2441_v8 = vpop.eup %2440  ;;  %v1210_v25 = vrot.slane %v2439_v2, 4 }
 0x71e   :  { %v2443_v10 = vpop.eup %2442  ;;  %v1169_v15 = vcombine.high %v2437_v0, %v2441_v8  ;;  %v1212_v16 = vrot.slane %v2441_v8, 5  ;;  %v2354_v0 = vpack.c.bf16 %v1530_v58, %v1529_v56  ;;  %v1548_v8 = vld [vmem:[#allocation9 + $0xa8] sm:$0xff] }
 0x71f   :  { %v1185_v32 = vcombine.high %v2439_v2, %v2443_v10  ;;  %v1213_v33 = vrot.slane %v2443_v10, 4  ;;  %v1211_v54 = vsel %vm510_vm3, %v1210_v25, %v1209_v24  ;;  %v1547_v2 = vld [vmem:[#allocation9 + $0xa0] sm:$0xff]  ;;  %v1549_v25 = vld [vmem:[#allocation9 + $0xb0] sm:$0xff] }
 0x720   :  { %v1176_v39 = vrot.slane %v1169_v15, %v2919_v42  ;;  %v2356_v10 = vpack.c.bf16 %v1548_v8, %v1547_v2  ;;  %v1531_v15 = vld [vmem:[#allocation9 + $0x20] sm:$0xff] }
 0x721   :  { %v1192_v41 = vrot.slane %v1185_v32, %v2919_v42  ;;  %v1214_v46 = vsel %vm510_vm3, %v1213_v33, %v1212_v16  ;;  %v1532_v16 = vld [vmem:[#allocation9 + $0x28] sm:$0xff]  ;;  %v1550_v32 = vld [vmem:[#allocation9 + $0xb8] sm:$0xff] }
 0x722   :  { %v1177_v48 = vcombine.high %v1176_v39, %v1176_v39  ;;  %1281 = vmatprep.mubr.f32.mxu0 %v1214_v46  ;;  %v2358_v24 = vpack.c.bf16 %v1532_v16, %v1531_v15  ;;  %v2360_v33 = vpack.c.bf16 %v1550_v32, %v1549_v25  ;;  %v1533_v39 = vld [vmem:[#allocation9 + $0x30] sm:$0xff] }
 0x723   :  { %v1193_v55 = vcombine.high %v1192_v41, %v1192_v41  ;;  %1282 = vmatmul.mubr.f32.vlgmr.msra.gmra.mrb[6].mxu0 %v1211_v54  ;;  %v1534_v41 = vld [vmem:[#allocation9 + $0x38] sm:$0xff]  ;;  %v1552_v54 = vld [vmem:[#allocation9 + $0xc8] sm:$0xff] }
 0x724   :  { %v1184_v62 = vrot.slane %v1177_v48, %v2919_v42  ;;  %2351 = vmatpush3.bf16.msra.mxu0 %v2350_v38  ;;  %v2362_v46 = vpack.c.bf16 %v1534_v41, %v1533_v39  ;;  %v1551_v48 = vld [vmem:[#allocation9 + $0xc0] sm:$0xff] }
 0x725   :  { %v1200_v63 = vrot.slane %v1193_v55, %v2919_v42  ;;  %2353 = vmatprep.subr.bf16.mxu0 %v2352_v49  ;;  %v2364_v55 = vpack.c.bf16 %v1552_v54, %v1551_v48 }
 0x726   :  { %1204 = vst.msk [vmem:[#allocation2 + $0x5] ss:$8 sm:$0x3] %vm2923_vm2, %v1184_v62  ;;  %v1535_v62 = vld [vmem:[#allocation9 + $0x40] sm:$0xff] }
 0x727   :  { %1207 = vst.msk [vmem:[#allocation2 + $0x15] ss:$8 sm:$0x3] %vm2923_vm2, %v1200_v63  ;;  %v1536_v63 = vld [vmem:[#allocation9 + $0x48] sm:$0xff] }
 0x728   :  { %2355 = vmatpush3.bf16.msra.mxu0 %v2354_v0 }
 0x729   :  { %2357 = vmatprep.subr.bf16.mxu0 %v2356_v10 }
 0x72c   :  { %2359 = vmatpush3.bf16.msra.mxu0 %v2358_v24 }
 0x72d   :  { %2361 = vmatprep.subr.bf16.mxu0 %v2360_v33 }
 0x730   :  { %2363 = vmatpush3.bf16.msra.mxu0 %v2362_v46 }
 0x731   :  { %2365 = vmatprep.subr.bf16.mxu0 %v2364_v55 }
 0x7f6   :  { %v1283_v4 = vpop.f32.mrb[6].mxu0 }
 0x7f7   :  { %v1290_v37 = vrot.slane %v1283_v4, 2  ;;  %v1292_v44 = vrot.slane %v1283_v4, 3  ;;  %v1285_v27 = vpop.f32.mrb[7].mxu0  ;;  %v2366_v4 = vpack.c.bf16 %v1536_v63, %v1535_v62 }
 0x7f8   :  { %v1291_v28 = vrot.slane %v1285_v27, 2  ;;  %v1293_v30 = vrot.slane %v1285_v27, 3 }
 0x7f9   :  { %v1298_v34 = vadd.f32 %v1290_v37, %v2906_v7  ;;  %v1300_v35 = vadd.f32 %v1292_v44, %v2912_v20  ;;  %2367 = vmatpush3.bf16.msra.mxu0 %v2366_v4  ;;  %v1553_v37 = vld [vmem:[#allocation9 + $0xd0] sm:$0xff]  ;;  %v1554_v44 = vld [vmem:[#allocation9 + $0xd8] sm:$0xff] }
 0x7fa   :  { %v1299_v36 = vadd.f32 %v1291_v28, %v2908_v11  ;;  %v1301_v43 = vadd.f32 %v1293_v30, %v2914_v26  ;;  %v2368_v27 = vpack.c.bf16 %v1554_v44, %v1553_v37  ;;  %v1537_v28 = vld [vmem:[#allocation9 + $0x50] sm:$0xff]  ;;  %v1538_v30 = vld [vmem:[#allocation9 + $0x58] sm:$0xff] }
 0x7fb   :  { %2444 = vtanh.f32 %v1298_v34  ;;  %v2370_v34 = vpack.c.bf16 %v1538_v30, %v1537_v28 }
 0x7fc   :  { %2446 = vtanh.f32 %v1300_v35  ;;  %2369 = vmatprep.subr.bf16.mxu0 %v2368_v27  ;;  %v1555_v35 = vld [vmem:[#allocation9 + $0xe0] sm:$0xff] }
 0x7fd   :  { %2448 = vtanh.f32 %v1299_v36  ;;  %2371 = vmatpush3.bf16.msra.mxu0 %v2370_v34  ;;  %v1556_v36 = vld [vmem:[#allocation9 + $0xe8] sm:$0xff] }
 0x7fe   :  { %2450 = vtanh.f32 %v1301_v43  ;;  %v2372_v43 = vpack.c.bf16 %v1556_v36, %v1555_v35 }
 0x800   :  { %2373 = vmatprep.subr.bf16.mxu0 %v2372_v43 }
 0x805   :  { %v2445_v17 = vpop.eup %2444 }
 0x806   :  { %v2447_v45 = vpop.eup %2446  ;;  %v1350_v60 = vrot.slane %v2445_v17, 6 }
 0x807   :  { %v2449_v50 = vpop.eup %2448  ;;  %v1351_v61 = vrot.slane %v2447_v45, 5 }
 0x808   :  { %v2451_v51 = vpop.eup %2450  ;;  %v1310_v52 = vcombine.high %v2445_v17, %v2449_v50  ;;  %v1353_v59 = vrot.slane %v2449_v50, 6  ;;  %v1539_v17 = vld [vmem:[#allocation9 + $0x60] sm:$0xff] }
 0x809   :  { %v1326_v1 = vcombine.high %v2447_v45, %v2451_v51  ;;  %v1354_v3 = vrot.slane %v2451_v51, 5  ;;  %v1352_v13 = vsel %vm510_vm3, %v1351_v61, %v1350_v60  ;;  %v1540_v45 = vld [vmem:[#allocation9 + $0x68] sm:$0xff]  ;;  %v1557_v51 = vld [vmem:[#allocation9 + $0xf0] sm:$0xff]  ;;  %v1542_v61 = vld [vmem:[#allocation9 + $0x78] sm:$0xff] }
 0x80a   :  { %v1317_v6 = vrot.slane %v1310_v52, %v2919_v42  ;;  %v2374_v50 = vpack.c.bf16 %v1540_v45, %v1539_v17  ;;  %v1558_v52 = vld [vmem:[#allocation9 + $0xf8] sm:$0xff] }
 0x80b   :  { %v1333_v9 = vrot.slane %v1326_v1, %v2919_v42  ;;  %v1355_v5 = vsel %vm510_vm3, %v1354_v3, %v1353_v59  ;;  %v1541_v59 = vld [vmem:[#allocation9 + $0x70] sm:$0xff]  ;;  %v2376_v60 = vpack.c.bf16 %v1558_v52, %v1557_v51 }
 0x80c   :  { %v1324_v12 = vrot.slane %v1317_v6, %v2919_v42  ;;  %1422 = vmatprep.mubr.f32.mxu1 %v1355_v5  ;;  %2375 = vmatpush3.bf16.msra.mxu0 %v2374_v50  ;;  %v2378_v1 = vpack.c.bf16 %v1542_v61, %v1541_v59 }
 0x80d   :  { %v1340_v14 = vrot.slane %v1333_v9, %v2919_v42  ;;  %1423 = vmatmul.mubr.f32.vlgmr.msra.gmra.mrb[12].mxu1 %v1352_v13  ;;  %2377 = vmatprep.subr.bf16.mxu0 %v2376_v60 }
 0x80e   :  { %v1325_v18 = vcombine.high %v1324_v12, %v1324_v12 }
 0x80f   :  { %v1341_v19 = vcombine.high %v1340_v14, %v1340_v14 }
 0x810   :  { %1345 = vst.msk [vmem:[#allocation2 + $0x6] ss:$8 sm:$0x3] %vm2923_vm2, %v1325_v18  ;;  %2379 = vmatpush3.bf16.msra.mxu0 %v2378_v1 }
 0x811   :  { %1348 = vst.msk [vmem:[#allocation2 + $0x16] ss:$8 sm:$0x3] %vm2923_vm2, %v1341_v19 }
 0x8e0   :  { %v1424_v3 = vpop.f32.mrb[12].mxu1 }
 0x8e1   :  { %v1431_v6 = vrot.slane %v1424_v3, 1  ;;  %v1433_v9 = vrot.slane %v1424_v3, 2  ;;  %v1426_v5 = vpop.f32.mrb[13].mxu1 }
 0x8e2   :  { %v1432_v12 = vrot.slane %v1426_v5, 1  ;;  %v1434_v13 = vrot.slane %v1426_v5, 2 }
 0x8e3   :  { %v1439_v14 = vadd.f32 %v1431_v6, %v2906_v7  ;;  %v1441_v18 = vadd.f32 %v1433_v9, %v2912_v20 }
 0x8e4   :  { %v1440_v19 = vadd.f32 %v1432_v12, %v2908_v11  ;;  %v1442_v23 = vadd.f32 %v1434_v13, %v2914_v26 }
 0x8e5   :  { %2452 = vtanh.f32 %v1439_v14 }
 0x8e6   :  { %2454 = vtanh.f32 %v1441_v18 }
 0x8e7   :  { %2456 = vtanh.f32 %v1440_v19 }
 0x8e8   :  { %2458 = vtanh.f32 %v1442_v23 }
 0x8ef   :  { %v2453_v31 = vpop.eup %2452 }
 0x8f0   :  { %v2455_v38 = vpop.eup %2454 }
 0x8f1   :  { %v2457_v47 = vpop.eup %2456 }
 0x8f2   :  { %v2459_v49 = vpop.eup %2458  ;;  %v1451_v7 = vcombine.high %v2453_v31, %v2457_v47 }
 0x8f3   :  { %v1468_v56 = vcombine.high %v2455_v38, %v2459_v49 }
 0x8f4   :  { %v1458_v20 = vrot.slane %v1451_v7, %v2919_v42  ;;  %v1499_v11 = vrot.slane %v1451_v7, %v1498_v40 }
 0x8f5   :  { %v1475_v26 = vrot.slane %v1468_v56, %v2919_v42  ;;  %v1507_v58 = vrot.slane %v1468_v56, %v1498_v40 }
 0x8f6   :  { %v1459_v0 = vcombine.high %v1458_v20, %v1458_v20  ;;  %v1500_v2 = vcombine.high %v1499_v11, %v1499_v11 }
 0x8f7   :  { %v1476_v8 = vcombine.high %v1475_v26, %v1475_v26  ;;  %v1508_v15 = vcombine.high %v1507_v58, %v1507_v58 }
 0x8f8   :  { %v1466_v10 = vrot.slane %v1459_v0, %v2919_v42  ;;  %v1509_v16 = vrot.slane %v1500_v2, 1 }
 0x8f9   :  { %v1483_v57 = vrot.slane %v1476_v8, %v2919_v42 }
 0x8fa   :  { %v1467_v24 = vcombine.high %v1466_v10, %v1466_v10  ;;  %v1514_v25 = vsel %vm510_vm3, %v1508_v15, %v1509_v16 }
 0x8fb   :  { %v1484_v32 = vcombine.high %v1483_v57, %v1483_v57  ;;  %v1516_v33 = vsel %vm1515_vm4, %v1508_v15, %v1514_v25 }
 0x8fc   :  { %1488 = vst.msk [vmem:[#allocation2 + $0x7] ss:$8 sm:$0x3] %vm2923_vm2, %v1467_v24  ;;  %v1518_v39 = vsel %vm1517_vm5, %v1508_v15, %v1516_v33 }
 0x8fd   :  { %1491 = vst.msk [vmem:[#allocation2 + $0x17] ss:$8 sm:$0x3] %vm2923_vm2, %v1484_v32  ;;  %v1520_v41 = vsel %vm1519_vm6, %v1508_v15, %v1518_v39 }
 0x8fe   :  { %1522 = vst [vmem:[#allocation12] sm:$0xf] %v1520_v41 }
 0x903   :  { %v1524_v46 = vld [vmem:[#allocation2 + $0x8] sm:$0xff]  ;;  %v1523_v48 = vld [vmem:[#allocation2] sm:$0xff] }
 0x904   :  { %1630 = vmatprep.mubr.f32.mxu0 %v1524_v46  ;;  %v1526_v42 = vld [vmem:[#allocation2 + $0x18] sm:$0xff]  ;;  %v1525_v54 = vld [vmem:[#allocation2 + $0x10] sm:$0xff] }
 0x905   :  { %1631 = vmatmul.mubr.f32.vlgmr.msra.gmra.mrb[8].mxu0 %v1523_v48 }
 0x906   :  { %1635 = vmatprep.mubr.f32.mxu0 %v1526_v42 }
 0x909   :  { %1636 = vmatmul.mubr.f32.gmra.mrb[10].mxu0 %v1525_v54 }
 0x90a   :  { %2559 = shalt.err (!%p2556_p8)
}
 0x90b   :  { %s2560_s22 = scalar_lea.hbm %s3230_s8, 64 }
 0x90c   :  { %p2561_p9 = scmp.ne.s32.totalorder %s3230_s8, %s2560_s22  ;;  %p2564_p10 = scmp.lt.u32.totalorder %s2560_s22, %s3230_s8 }
 0x90e   :  { %p2566_p11 = pnand %p2564_p10, %p2561_p9 }
 0x910   :  { %2569 = shalt.err (!%p2566_p11)
}
 0x911   :  { %1664 = dma.vmem_to_hbm [thread:$0]  %s1662_s13, 64, %s3230_s8, [#allocation13]   ;;  %v1680_v55 = vld [vmem:[%s3228_s6] ss:$0 sm:$0xff] }
 0x912   :  { %s2616_s30 = smov [#allocation11]  }
 0x913   :  { %s1648_s9 = sshll.u32 %s2616_s30, 4  ;;  %s1649_s9 = int_to_ptr.vmem [resolvable:$true] %s1648_s9 }
 0x914   :  { %s2570_s10 = scalar_lea.vmem %s1649_s9, 256  ;;  %p2575_p13 = scmp.lt.s32.totalorder %s1649_s9, %s1649_s9 }
 0x915   :  { %p2571_p12 = scmp.ne.s32.totalorder %s1649_s9, %s2570_s10  ;;  %p2576_p0 = scmp.lt.s32.totalorder %s2570_s10, %s2570_s10 }
 0x917   :  { %p2577_p1 = por %p2576_p0, %p2575_p13 }
 0x919   :  { %p2578_p2 = pnand %p2577_p1, %p2571_p12 }
 0x9d8   :  { %v1731_v53 = vpop.f32.mrb[8].mxu0 }
 0x9d9   :  { %v1732_v62 = vpop.f32.mrb[9].mxu0 }
 0x9da   :  { %v1733_v63 = vadd.f32 %v1732_v62, %v1731_v53 }
 0x9dc   :  { %v1633_v4 = vadd.f32 %v1733_v63, %v1680_v55  ;;  %v1734_v37 = vpop.f32.mrb[10].mxu0 }
 0x9dd   :  { %v1735_v44 = vpop.f32.mrb[11].mxu0 }
 0x9de   :  { %1641 = vst [vmem:[#allocation11] sm:$0xff] %v1633_v4  ;;  %v1736_v27 = vadd.f32 %v1735_v44, %v1734_v37 }
 0x9e0   :  { %v1638_v28 = vadd.f32 %v1736_v27, %v1680_v55 }
 0x9e2   :  { %1642 = vst [vmem:[#allocation11 + $0x8] sm:$0xff] %v1638_v28 }
 0x9e3   :  { %2581 = shalt.err (!%p2578_p2)
}
 0x9e4   :  { %s2582_s12 = scalar_lea.hbm %s3229_s7, 256 }
 0x9e5   :  { %p2583_p3 = scmp.ne.s32.totalorder %s3229_s7, %s2582_s12  ;;  %p2586_p4 = scmp.lt.u32.totalorder %s2582_s12, %s3229_s7 }
 0x9e7   :  { %p2588_p5 = pnand %p2586_p4, %p2583_p3 }
 0x9e9   :  { %2591 = shalt.err (!%p2588_p5)
}
 0x9ea   :  { %1654 = dma.vmem_to_hbm [thread:$0]  %s1649_s9, 256, %s3229_s7, [#allocation5], %s2606_s2, %s2606_s2, %s2607_s28  }
 0x9eb   :  { %2598 = dma.done.wait [#allocation5], 256  }
 0x9ec   :  { %2599 = vsyncadd [#allocation5], 4294967040 }
 0x9ed   :  { %2600 = dma.done.wait [#allocation13], 64  }
 0x9ee   :  { %2601 = vsyncadd [#allocation13], 4294967232 }
 0x9ef   :  { %1671 = vsyncpa [#allocation4], 1 }
 0x9f0   :  { %1672 = vsyncpa [#allocation7], 1 }
 0x9f1   :  { %1673 = vsyncpa [#allocation10], 1 }
 0x9f2   :  { %1674 = vsyncpa [#allocation5], 1 }
 0x9f3   :  { %1675 = vsyncpa [#allocation13], 1 }

</bundles_post_ra>
